<compile_context>
chip_gen: v7x
topology: tpu7x:2x2x1
jax: 0.10.0
libtpu: 0.0.40
codegen_flags: <defaults>
</compile_context>

<pallas_src>
import jax
import jax.numpy as jnp
from jax.experimental import pallas as pl
from jax.experimental.pallas import tpu as pltpu

K_IN = 28 * 28        # 784
K_PAD = 896           # 7 * 128, lane-aligned contraction for fc1
N1, N2, N3 = 512, 256, 128
N_OUT = 10
N_OUT_PAD = 128       # lane-dense output width


def _round_up(x, m):
    return ((x + m - 1) // m) * m


def _mlp_kernel(x_ref, w1_ref, b1_ref, w2_ref, b2_ref,
                w3_ref, b3_ref, w4_ref, b4_ref, o_ref):
    # fc1 + relu  (bf16 in, f32 accumulate, bias/relu in f32, back to bf16)
    h = jnp.dot(x_ref[...], w1_ref[...], preferred_element_type=jnp.float32)
    h = jnp.maximum(h + b1_ref[...], 0.0).astype(jnp.bfloat16)
    # dropout1: identity at inference (p=0.2 only active in training)
    # fc2 + relu
    h = jnp.dot(h, w2_ref[...], preferred_element_type=jnp.float32)
    h = jnp.maximum(h + b2_ref[...], 0.0).astype(jnp.bfloat16)
    # dropout2: identity at inference
    # fc3 + relu
    h = jnp.dot(h, w3_ref[...], preferred_element_type=jnp.float32)
    h = jnp.maximum(h + b3_ref[...], 0.0).astype(jnp.bfloat16)
    # dropout3: identity at inference
    # fc4 (logits, no activation) -- 128-wide lane-dense output block
    o_ref[...] = (jnp.dot(h, w4_ref[...], preferred_element_type=jnp.float32)
                  + b4_ref[...]).astype(o_ref.dtype)


def digit_classifier_forward(x_nchw, params, tile_b=None):
    """x_nchw: (B, 1, 28, 28) float32 -> logits (B, 10) float32."""
    B = x_nchw.shape[0]
    w1, b1, w2, b2, w3, b3, w4, b4 = params

    # nn.Flatten -> (B, 784); cast activations to bf16 for the MXU path.
    x = x_nchw.reshape(B, -1).astype(jnp.bfloat16)

    # Pad contraction dim 784 -> 896 (zeros contribute nothing to the dot).
    x = jnp.pad(x, ((0, 0), (0, K_PAD - K_IN)))
    w1p = jnp.pad(w1.astype(jnp.bfloat16), ((0, K_PAD - K_IN), (0, 0)))
    w2b = w2.astype(jnp.bfloat16)
    w3b = w3.astype(jnp.bfloat16)
    # Lane-dense output: pad fc4 out-features 10 -> 128.
    w4p = jnp.pad(w4.astype(jnp.bfloat16), ((0, 0), (0, N_OUT_PAD - N_OUT)))
    b4p = jnp.pad(b4, ((0, 0), (0, N_OUT_PAD - N_OUT)))

    # Batch tile: >=128 rows for MXU utilization, capped at 1024 so the
    # double-buffered tiles stay well inside v7x's 64 MiB VMEM.
    if tile_b is None:
        tile_b = min(1024, _round_up(max(B, 1), 128))
    b_pad = _round_up(B, tile_b)
    if b_pad != B:
        x = jnp.pad(x, ((0, b_pad - B), (0, 0)))

    grid = (b_pad // tile_b,)

    act_in_spec = pl.BlockSpec((tile_b, K_PAD), lambda i: (i, 0))
    act_out_spec = pl.BlockSpec((tile_b, N_OUT_PAD), lambda i: (i, 0))
    # Weights/biases: constant block index -> stay resident in VMEM across steps.
    const = lambda i: (0, 0)
    in_specs = [
        act_in_spec,
        pl.BlockSpec((K_PAD, N1), const), pl.BlockSpec((1, N1), const),
        pl.BlockSpec((N1, N2), const),    pl.BlockSpec((1, N2), const),
        pl.BlockSpec((N2, N3), const),    pl.BlockSpec((1, N3), const),
        pl.BlockSpec((N3, N_OUT_PAD), const), pl.BlockSpec((1, N_OUT_PAD), const),
    ]

    out = pl.pallas_call(
        _mlp_kernel,
        out_shape=jax.ShapeDtypeStruct((b_pad, N_OUT_PAD), jnp.float32),
        grid_spec=pltpu.PrefetchScalarGridSpec(
            num_scalar_prefetch=0,
            grid=grid,
            in_specs=in_specs,
            out_specs=act_out_spec,
        ),
        compiler_params=pltpu.CompilerParams(
            dimension_semantics=("parallel",),
            vmem_limit_bytes=64 * 1024 * 1024,
        ),
    )(x, w1p, b1, w2b, b2, w3b, b3, w4p, b4p)

    # Strip batch padding and the lane padding on the logits.
    return out[:B, :N_OUT]


def init_params(key):
    """Deterministic synthetic parameters with nn.Linear shapes (stored transposed)."""
    dims = [(K_IN, N1), (N1, N2), (N2, N3), (N3, N_OUT)]
    params = []
    for fan_in, fan_out in dims:
        kw, kb, key = jax.random.split(key, 3)
        bound = 1.0 / jnp.sqrt(fan_in)
        w = jax.random.uniform(kw, (fan_in, fan_out), jnp.float32, -bound, bound)
        b = jax.random.uniform(kb, (1, fan_out), jnp.float32, -bound, bound)
        params += [w, b]
    return params


def _reference_forward(x_nchw, params):
    """Pure-JAX reference mirroring the kernel's bf16-in / f32-accumulate math."""
    w1, b1, w2, b2, w3, b3, w4, b4 = params

    def lin(h, w, b, relu):
        y = jnp.dot(h, w.astype(jnp.bfloat16),
                    preferred_element_type=jnp.float32) + b
        if relu:
            y = jnp.maximum(y, 0.0).astype(jnp.bfloat16)
        return y

    h = x_nchw.reshape(x_nchw.shape[0], -1).astype(jnp.bfloat16)
    h = lin(h, w1, b1, True)
    h = lin(h, w2, b2, True)
    h = lin(h, w3, b3, True)
    return lin(h, w4, b4, False)


if __name__ == "__main__":
    key = jax.random.PRNGKey(0)
    kx, kp = jax.random.split(key)

    # Small MNIST-like batch: (B=2, C=1, H=28, W=28), NCHW like PyTorch.
    x = jax.random.normal(kx, (2, 1, 28, 28), dtype=jnp.float32)
    params = init_params(kp)

    logits = digit_classifier_forward(x, params)
    jax.block_until_ready(logits)

    ref = _reference_forward(x, params)
    assert logits.shape == (2, N_OUT)
    assert jnp.allclose(logits, ref, atol=2e-2, rtol=2e-2), (
        jnp.max(jnp.abs(logits - ref)))

    print("KERNEL_OK")
</pallas_src>

<mosaic_0001>
module attributes {stable_mosaic.version = 11 : i64} {
  func.func @_mlp_kernel(%arg0: i32, %arg1: memref<128x896xbf16, #tpu.memory_space<vmem>>, %arg2: memref<896x512xbf16, #tpu.memory_space<vmem>>, %arg3: memref<1x512xf32, #tpu.memory_space<vmem>>, %arg4: memref<512x256xbf16, #tpu.memory_space<vmem>>, %arg5: memref<1x256xf32, #tpu.memory_space<vmem>>, %arg6: memref<256x128xbf16, #tpu.memory_space<vmem>>, %arg7: memref<1x128xf32, #tpu.memory_space<vmem>>, %arg8: memref<128x128xbf16, #tpu.memory_space<vmem>>, %arg9: memref<1x128xf32, #tpu.memory_space<vmem>>, %arg10: memref<128x128xf32, #tpu.memory_space<vmem>>) attributes {dimension_semantics = [#tpu.dimension_semantics<parallel>], iteration_bounds = array<i64: 1>, scalar_prefetch = 0 : i64, scratch_operands = 0 : i64, tpu.core_type = #tpu.core_type<tc>, window_params = [{transform_indices = @transform_0, window_bounds = array<i64: 128, 896>}, {pipeline_mode = #tpu.pipeline_mode<synchronous>, transform_indices = @transform_1, window_bounds = array<i64: 896, 512>}, {pipeline_mode = #tpu.pipeline_mode<synchronous>, transform_indices = @transform_2, window_bounds = array<i64: 1, 512>}, {pipeline_mode = #tpu.pipeline_mode<synchronous>, transform_indices = @transform_3, window_bounds = array<i64: 512, 256>}, {pipeline_mode = #tpu.pipeline_mode<synchronous>, transform_indices = @transform_4, window_bounds = array<i64: 1, 256>}, {pipeline_mode = #tpu.pipeline_mode<synchronous>, transform_indices = @transform_5, window_bounds = array<i64: 256, 128>}, {pipeline_mode = #tpu.pipeline_mode<synchronous>, transform_indices = @transform_6, window_bounds = array<i64: 1, 128>}, {pipeline_mode = #tpu.pipeline_mode<synchronous>, transform_indices = @transform_7, window_bounds = array<i64: 128, 128>}, {pipeline_mode = #tpu.pipeline_mode<synchronous>, transform_indices = @transform_8, window_bounds = array<i64: 1, 128>}, {transform_indices = @transform_9, window_bounds = array<i64: 128, 128>}]} {
    %c0 = arith.constant 0 : index
    %c0_0 = arith.constant 0 : index
    %0 = vector.load %arg1[%c0, %c0_0] : memref<128x896xbf16, #tpu.memory_space<vmem>>, vector<128x896xbf16>
    %c0_1 = arith.constant 0 : index
    %c0_2 = arith.constant 0 : index
    %1 = vector.load %arg2[%c0_1, %c0_2] : memref<896x512xbf16, #tpu.memory_space<vmem>>, vector<896x512xbf16>
    %cst = arith.constant dense<0.000000e+00> : vector<128x512xf32>
    %2 = tpu.matmul %0, %1, %cst {dimension_numbers = #tpu.dot_dimension_numbers<[1], [0], [0], [1], [0, 0, 1, 1], [], []>} : vector<128x896xbf16>, vector<896x512xbf16>, vector<128x512xf32> -> vector<128x512xf32>
    %c0_3 = arith.constant 0 : index
    %c0_4 = arith.constant 0 : index
    %3 = vector.load %arg3[%c0_3, %c0_4] : memref<1x512xf32, #tpu.memory_space<vmem>>, vector<1x512xf32>
    %4 = vector.broadcast %3 : vector<1x512xf32> to vector<128x512xf32>
    %5 = arith.addf %2, %4 : vector<128x512xf32>
    %cst_5 = arith.constant 0.000000e+00 : f32
    %6 = vector.broadcast %cst_5 : f32 to vector<128x512xf32>
    %7 = arith.maximumf %5, %6 : vector<128x512xf32>
    %8 = arith.truncf %7 : vector<128x512xf32> to vector<128x512xbf16>
    %c0_6 = arith.constant 0 : index
    %c0_7 = arith.constant 0 : index
    %9 = vector.load %arg4[%c0_6, %c0_7] : memref<512x256xbf16, #tpu.memory_space<vmem>>, vector<512x256xbf16>
    %cst_8 = arith.constant dense<0.000000e+00> : vector<128x256xf32>
    %10 = tpu.matmul %8, %9, %cst_8 {dimension_numbers = #tpu.dot_dimension_numbers<[1], [0], [0], [1], [0, 0, 1, 1], [], []>} : vector<128x512xbf16>, vector<512x256xbf16>, vector<128x256xf32> -> vector<128x256xf32>
    %c0_9 = arith.constant 0 : index
    %c0_10 = arith.constant 0 : index
    %11 = vector.load %arg5[%c0_9, %c0_10] : memref<1x256xf32, #tpu.memory_space<vmem>>, vector<1x256xf32>
    %12 = vector.broadcast %11 : vector<1x256xf32> to vector<128x256xf32>
    %13 = arith.addf %10, %12 : vector<128x256xf32>
    %cst_11 = arith.constant 0.000000e+00 : f32
    %14 = vector.broadcast %cst_11 : f32 to vector<128x256xf32>
    %15 = arith.maximumf %13, %14 : vector<128x256xf32>
    %16 = arith.truncf %15 : vector<128x256xf32> to vector<128x256xbf16>
    %c0_12 = arith.constant 0 : index
    %c0_13 = arith.constant 0 : index
    %17 = vector.load %arg6[%c0_12, %c0_13] : memref<256x128xbf16, #tpu.memory_space<vmem>>, vector<256x128xbf16>
    %cst_14 = arith.constant dense<0.000000e+00> : vector<128x128xf32>
    %18 = tpu.matmul %16, %17, %cst_14 {dimension_numbers = #tpu.dot_dimension_numbers<[1], [0], [0], [1], [0, 0, 1, 1], [], []>} : vector<128x256xbf16>, vector<256x128xbf16>, vector<128x128xf32> -> vector<128x128xf32>
    %c0_15 = arith.constant 0 : index
    %c0_16 = arith.constant 0 : index
    %19 = vector.load %arg7[%c0_15, %c0_16] : memref<1x128xf32, #tpu.memory_space<vmem>>, vector<1x128xf32>
    %20 = vector.broadcast %19 : vector<1x128xf32> to vector<128x128xf32>
    %21 = arith.addf %18, %20 : vector<128x128xf32>
    %cst_17 = arith.constant 0.000000e+00 : f32
    %22 = vector.broadcast %cst_17 : f32 to vector<128x128xf32>
    %23 = arith.maximumf %21, %22 : vector<128x128xf32>
    %24 = arith.truncf %23 : vector<128x128xf32> to vector<128x128xbf16>
    %c0_18 = arith.constant 0 : index
    %c0_19 = arith.constant 0 : index
    %25 = vector.load %arg8[%c0_18, %c0_19] : memref<128x128xbf16, #tpu.memory_space<vmem>>, vector<128x128xbf16>
    %cst_20 = arith.constant dense<0.000000e+00> : vector<128x128xf32>
    %26 = tpu.matmul %24, %25, %cst_20 {dimension_numbers = #tpu.dot_dimension_numbers<[1], [0], [0], [1], [0, 0, 1, 1], [], []>} : vector<128x128xbf16>, vector<128x128xbf16>, vector<128x128xf32> -> vector<128x128xf32>
    %c0_21 = arith.constant 0 : index
    %c0_22 = arith.constant 0 : index
    %27 = vector.load %arg9[%c0_21, %c0_22] : memref<1x128xf32, #tpu.memory_space<vmem>>, vector<1x128xf32>
    %28 = vector.broadcast %27 : vector<1x128xf32> to vector<128x128xf32>
    %29 = arith.addf %26, %28 : vector<128x128xf32>
    %c0_23 = arith.constant 0 : index
    %c0_24 = arith.constant 0 : index
    %30 = vector.load %arg10[%c0_23, %c0_24] : memref<128x128xf32, #tpu.memory_space<vmem>>, vector<128x128xf32>
    tpu.vector_store %arg10[%c0_23, %c0_24], %29 {strides = array<i32>} : memref<128x128xf32, #tpu.memory_space<vmem>>, vector<128x128xf32>,
    return
  }
  func.func @transform_0(%arg0: i32) -> (i32, i32) {
    %c0_i32 = arith.constant 0 : i32
    %c0_i32_0 = arith.constant 0 : i32
    return %arg0, %c0_i32 : i32, i32
  }
  func.func @transform_1(%arg0: i32) -> (i32, i32) {
    %c0_i32 = arith.constant 0 : i32
    %c0_i32_0 = arith.constant 0 : i32
    %c0_i32_1 = arith.constant 0 : i32
    return %c0_i32, %c0_i32_0 : i32, i32
  }
  func.func @transform_2(%arg0: i32) -> (i32, i32) {
    %c0_i32 = arith.constant 0 : i32
    %c0_i32_0 = arith.constant 0 : i32
    %c0_i32_1 = arith.constant 0 : i32
    return %c0_i32, %c0_i32_0 : i32, i32
  }
  func.func @transform_3(%arg0: i32) -> (i32, i32) {
    %c0_i32 = arith.constant 0 : i32
    %c0_i32_0 = arith.constant 0 : i32
    %c0_i32_1 = arith.constant 0 : i32
    return %c0_i32, %c0_i32_0 : i32, i32
  }
  func.func @transform_4(%arg0: i32) -> (i32, i32) {
    %c0_i32 = arith.constant 0 : i32
    %c0_i32_0 = arith.constant 0 : i32
    %c0_i32_1 = arith.constant 0 : i32
    return %c0_i32, %c0_i32_0 : i32, i32
  }
  func.func @transform_5(%arg0: i32) -> (i32, i32) {
    %c0_i32 = arith.constant 0 : i32
    %c0_i32_0 = arith.constant 0 : i32
    %c0_i32_1 = arith.constant 0 : i32
    return %c0_i32, %c0_i32_0 : i32, i32
  }
  func.func @transform_6(%arg0: i32) -> (i32, i32) {
    %c0_i32 = arith.constant 0 : i32
    %c0_i32_0 = arith.constant 0 : i32
    %c0_i32_1 = arith.constant 0 : i32
    return %c0_i32, %c0_i32_0 : i32, i32
  }
  func.func @transform_7(%arg0: i32) -> (i32, i32) {
    %c0_i32 = arith.constant 0 : i32
    %c0_i32_0 = arith.constant 0 : i32
    %c0_i32_1 = arith.constant 0 : i32
    return %c0_i32, %c0_i32_0 : i32, i32
  }
  func.func @transform_8(%arg0: i32) -> (i32, i32) {
    %c0_i32 = arith.constant 0 : i32
    %c0_i32_0 = arith.constant 0 : i32
    %c0_i32_1 = arith.constant 0 : i32
    return %c0_i32, %c0_i32_0 : i32, i32
  }
  func.func @transform_9(%arg0: i32) -> (i32, i32) {
    %c0_i32 = arith.constant 0 : i32
    %c0_i32_0 = arith.constant 0 : i32
    return %arg0, %c0_i32 : i32, i32
  }
}

</mosaic_0001>

<bundles_post_ra>
// kernel: tpu_custom_call.1
= control target key start
LH: loop header
LB: loop body
LE: loop exit
PB: predicated region body
PF: predicated region fallthrough
CT: control target
= control target key end

     0   :  { %14 = vsyncpa [#allocation3], 0  ;;  %s5976_s0 = inlined_call_operand.hbm [shape: bf16[128,896], index: 0, kind: input, shape index: {}]   ;;  %s5977_s1 = inlined_call_operand.hbm [shape: bf16[896,512], index: 1, kind: input, shape index: {}]   ;;  %s5978_s2 = inlined_call_operand.hbm [shape: f32[1,512], index: 2, kind: input, shape index: {}]   ;;  %s5979_s3 = inlined_call_operand.hbm [shape: bf16[512,256], index: 3, kind: input, shape index: {}]   ;;  %s5980_s4 = inlined_call_operand.hbm [shape: f32[1,256], index: 4, kind: input, shape index: {}]   ;;  %s5981_s5 = inlined_call_operand.hbm [shape: bf16[256,128], index: 5, kind: input, shape index: {}]   ;;  %s5982_s6 = inlined_call_operand.hbm [shape: f32[1,128], index: 6, kind: input, shape index: {}]   ;;  %s5983_s7 = inlined_call_operand.hbm [shape: bf16[128,128], index: 7, kind: input, shape index: {}]   ;;  %s5984_s8 = inlined_call_operand.hbm [shape: f32[1,128], index: 8, kind: input, shape index: {}]   ;;  %s5985_s9 = inlined_call_operand.hbm [shape: f32[128,128], index: 9, kind: output, shape index: {}]  }
   0x1   :  { %15 = vsyncpa [#allocation6], 0 }
   0x2   :  { %16 = vsyncpa [#allocation9], 0 }
   0x3   :  { %17 = vsyncpa [#allocation12], 0 }
   0x4   :  { %18 = vsyncpa [#allocation15], 0 }
   0x5   :  { %19 = vsyncpa [#allocation4], 0  ;;  %s5586_s30 = smov [#allocation5]   ;;  %s5354_s13 = scalar_lea.hbm %s5977_s1, 28672 }
   0x6   :  { %s37_s10 = sshll.u32 %s5586_s30, 4  ;;  %p5355_p0 = scmp.ne.s32.totalorder %s5977_s1, %s5354_s13  ;;  %s38_s10 = int_to_ptr.vmem [resolvable:$true] %s37_s10 }
   0x7   :  { %p5358_p1 = scmp.lt.u32.totalorder %s5354_s13, %s5977_s1 }
   0x9   :  { %p5360_p2 = pnand %p5358_p1, %p5355_p0 }
   0xb   :  { %5363 = shalt.err (!%p5360_p2)
}
   0xc   :  { %s5364_s18 = scalar_lea.vmem %s38_s10, 28672  ;;  %p5369_p4 = scmp.lt.s32.totalorder %s38_s10, %s38_s10 }
   0xd   :  { %p5365_p3 = scmp.ne.s32.totalorder %s38_s10, %s5364_s18  ;;  %p5370_p5 = scmp.lt.s32.totalorder %s5364_s18, %s5364_s18 }
   0xf   :  { %p5371_p6 = por %p5370_p5, %p5369_p4 }
  0x11   :  { %p5372_p7 = pnand %p5371_p6, %p5365_p3 }
  0x13   :  { %5375 = shalt.err (!%p5372_p7)
}
  0x14   :  { %s5587_s19 = smov 256   ;;  %s5588_s20 = smov 16  }
  0x15   :  { %43 = dma.hbm_to_vmem [thread:$0]  %s5977_s1, 28672, %s38_s10, [#allocation6], %s5587_s19, %s5587_s19, %s5588_s20  }
  0x16   :  { %s5589_s23 = smov [#allocation8]   ;;  %s5376_s27 = scalar_lea.hbm %s5979_s3, 8192 }
  0x17   :  { %s59_s24 = sshll.u32 %s5589_s23, 4  ;;  %p5377_p8 = scmp.ne.s32.totalorder %s5979_s3, %s5376_s27  ;;  %s60_s24 = int_to_ptr.vmem [resolvable:$true] %s59_s24 }
  0x18   :  { %p5380_p9 = scmp.lt.u32.totalorder %s5376_s27, %s5979_s3 }
  0x1a   :  { %p5382_p10 = pnand %p5380_p9, %p5377_p8 }
  0x1c   :  { %5385 = shalt.err (!%p5382_p10)
}
  0x1d   :  { %s5386_s12 = scalar_lea.vmem %s60_s24, 8192  ;;  %p5391_p12 = scmp.lt.s32.totalorder %s60_s24, %s60_s24 }
  0x1e   :  { %p5387_p11 = scmp.ne.s32.totalorder %s60_s24, %s5386_s12  ;;  %p5392_p13 = scmp.lt.s32.totalorder %s5386_s12, %s5386_s12 }
  0x20   :  { %p5393_p0 = por %p5392_p13, %p5391_p12 }
  0x22   :  { %p5394_p1 = pnand %p5393_p0, %p5387_p11 }
  0x24   :  { %5397 = shalt.err (!%p5394_p1)
}
  0x25   :  { %s5590_s1 = smov 128   ;;  %s5591_s10 = smov 8  }
  0x26   :  { %65 = dma.hbm_to_vmem [thread:$0]  %s5979_s3, 8192, %s60_s24, [#allocation9], %s5590_s1, %s5590_s1, %s5591_s10  }
  0x27   :  { %s5592_s15 = smov [#allocation11]   ;;  %s5398_s19 = scalar_lea.hbm %s5981_s5, 2048 }
  0x28   :  { %s81_s16 = sshll.u32 %s5592_s15, 4  ;;  %p5399_p2 = scmp.ne.s32.totalorder %s5981_s5, %s5398_s19  ;;  %s82_s16 = int_to_ptr.vmem [resolvable:$true] %s81_s16 }
  0x29   :  { %p5402_p3 = scmp.lt.u32.totalorder %s5398_s19, %s5981_s5 }
  0x2b   :  { %p5404_p4 = pnand %p5402_p3, %p5399_p2 }
  0x2d   :  { %5407 = shalt.err (!%p5404_p4)
}
  0x2e   :  { %s5408_s25 = scalar_lea.vmem %s82_s16, 2048  ;;  %p5413_p6 = scmp.lt.s32.totalorder %s82_s16, %s82_s16 }
  0x2f   :  { %p5409_p5 = scmp.ne.s32.totalorder %s82_s16, %s5408_s25  ;;  %p5414_p7 = scmp.lt.s32.totalorder %s5408_s25, %s5408_s25 }
  0x31   :  { %p5415_p8 = por %p5414_p7, %p5413_p6 }
  0x33   :  { %p5416_p9 = pnand %p5415_p8, %p5409_p5 }
  0x35   :  { %5419 = shalt.err (!%p5416_p9)
}
  0x36   :  { %s5593_s3 = smov 64   ;;  %s5594_s24 = smov 4  }
  0x37   :  { %87 = dma.hbm_to_vmem [thread:$0]  %s5981_s5, 2048, %s82_s16, [#allocation12], %s5593_s3, %s5593_s3, %s5594_s24  }
  0x38   :  { %s5595_s28 = smov [#allocation14]   ;;  %s5596_s30 = smov [#allocation2]  }
  0x39   :  { %s103_s29 = sshll.u32 %s5595_s28, 4  ;;  %s25_s11 = sshll.u32 %s5596_s30, 4  ;;  %s104_s29 = int_to_ptr.vmem [resolvable:$true] %s103_s29  ;;  %s26_s11 = int_to_ptr.vmem [resolvable:$true] %s25_s11 }
  0x3a   :  { %s5420_s14 = scalar_lea.hbm %s5983_s7, 1024 }
  0x3b   :  { %p5421_p10 = scmp.ne.s32.totalorder %s5983_s7, %s5420_s14  ;;  %p5424_p11 = scmp.lt.u32.totalorder %s5420_s14, %s5983_s7 }
  0x3d   :  { %p5426_p12 = pnand %p5424_p11, %p5421_p10 }
  0x3f   :  { %5429 = shalt.err (!%p5426_p12)
}
  0x40   :  { %s5430_s5 = scalar_lea.vmem %s104_s29, 1024  ;;  %p5435_p0 = scmp.lt.s32.totalorder %s104_s29, %s104_s29 }
  0x41   :  { %p5431_p13 = scmp.ne.s32.totalorder %s104_s29, %s5430_s5  ;;  %p5436_p1 = scmp.lt.s32.totalorder %s5430_s5, %s5430_s5 }
  0x43   :  { %p5437_p2 = por %p5436_p1, %p5435_p0 }
  0x45   :  { %p5438_p3 = pnand %p5437_p2, %p5431_p13 }
  0x47   :  { %5441 = shalt.err (!%p5438_p3)
}
  0x48   :  { %109 = dma.hbm_to_vmem [thread:$0]  %s5983_s7, 1024, %s104_s29, [#allocation15], %s5593_s3, %s5593_s3, %s5594_s24  }
  0x49   :  { %s5442_s23 = scalar_lea.hbm %s5976_s0, 7168 }
  0x4a   :  { %p5443_p4 = scmp.ne.s32.totalorder %s5976_s0, %s5442_s23  ;;  %p5446_p5 = scmp.lt.u32.totalorder %s5442_s23, %s5976_s0 }
  0x4c   :  { %p5448_p6 = pnand %p5446_p5, %p5443_p4 }
  0x4e   :  { %5451 = shalt.err (!%p5448_p6)
}
  0x4f   :  { %s5452_s30 = scalar_lea.vmem %s26_s11, 7168  ;;  %p5457_p8 = scmp.lt.s32.totalorder %s26_s11, %s26_s11 }
  0x50   :  { %p5453_p7 = scmp.ne.s32.totalorder %s26_s11, %s5452_s30  ;;  %p5458_p9 = scmp.lt.s32.totalorder %s5452_s30, %s5452_s30 }
  0x52   :  { %p5459_p10 = por %p5458_p9, %p5457_p8 }
  0x54   :  { %p5460_p11 = pnand %p5459_p10, %p5453_p7 }
  0x56   :  { %5463 = shalt.err (!%p5460_p11)
}
  0x57   :  { %s5597_s7 = smov 448   ;;  %s5598_s3 = smov 28  }
  0x58   :  { %31 = dma.hbm_to_vmem [thread:$0]  %s5976_s0, 7168, %s26_s11, [#allocation3], %s5597_s7, %s5597_s7, %s5598_s3  }
  0x59   :  { %s5599_s12 = smov [#allocation7]   ;;  %s5600_s14 = smov [#allocation10]  }
  0x5a   :  { %s50_s13 = sshll.u32 %s5599_s12, 4  ;;  %s72_s15 = sshll.u32 %s5600_s14, 4  ;;  %s51_s13 = int_to_ptr.vmem [resolvable:$true] %s50_s13  ;;  %s73_s15 = int_to_ptr.vmem [resolvable:$true] %s72_s15 }
  0x5b   :  { %s5464_s19 = scalar_lea.hbm %s5978_s2, 64 }
  0x5c   :  { %p5465_p12 = scmp.ne.s32.totalorder %s5978_s2, %s5464_s19  ;;  %p5468_p13 = scmp.lt.u32.totalorder %s5464_s19, %s5978_s2 }
  0x5e   :  { %p5470_p0 = pnand %p5468_p13, %p5465_p12 }
  0x60   :  { %5473 = shalt.err (!%p5470_p0)
}
  0x61   :  { %s5474_s0 = scalar_lea.vmem %s51_s13, 64  ;;  %p5479_p2 = scmp.lt.s32.totalorder %s51_s13, %s51_s13 }
  0x62   :  { %p5475_p1 = scmp.ne.s32.totalorder %s51_s13, %s5474_s0  ;;  %p5480_p3 = scmp.lt.s32.totalorder %s5474_s0, %s5474_s0 }
  0x64   :  { %p5481_p4 = por %p5480_p3, %p5479_p2 }
  0x66   :  { %p5482_p5 = pnand %p5481_p4, %p5475_p1 }
  0x68   :  { %5485 = shalt.err (!%p5482_p5)
}
  0x69   :  { %53 = dma.hbm_to_vmem [thread:$0]  %s5978_s2, 64, %s51_s13, [#allocation6]  }
  0x6a   :  { %s5486_s26 = scalar_lea.hbm %s5980_s4, 32 }
  0x6b   :  { %p5487_p6 = scmp.ne.s32.totalorder %s5980_s4, %s5486_s26  ;;  %p5490_p7 = scmp.lt.u32.totalorder %s5486_s26, %s5980_s4 }
  0x6d   :  { %p5492_p8 = pnand %p5490_p7, %p5487_p6 }
  0x6f   :  { %5495 = shalt.err (!%p5492_p8)
}
  0x70   :  { %s5496_s3 = scalar_lea.vmem %s73_s15, 32  ;;  %p5501_p10 = scmp.lt.s32.totalorder %s73_s15, %s73_s15 }
  0x71   :  { %p5497_p9 = scmp.ne.s32.totalorder %s73_s15, %s5496_s3  ;;  %p5502_p11 = scmp.lt.s32.totalorder %s5496_s3, %s5496_s3 }
  0x73   :  { %p5503_p12 = por %p5502_p11, %p5501_p10 }
  0x75   :  { %p5504_p13 = pnand %p5503_p12, %p5497_p9 }
  0x77   :  { %5507 = shalt.err (!%p5504_p13)
}
  0x78   :  { %75 = dma.hbm_to_vmem [thread:$0]  %s5980_s4, 32, %s73_s15, [#allocation9]  }
  0x79   :  { %s5601_s29 = smov [#allocation13]   ;;  %s5602_s13 = smov [#allocation16]  }
  0x7a   :  { %s94_s12 = sshll.u32 %s5601_s29, 4  ;;  %s116_s14 = sshll.u32 %s5602_s13, 4  ;;  %s95_s12 = int_to_ptr.vmem [resolvable:$true] %s94_s12  ;;  %s117_s14 = int_to_ptr.vmem [resolvable:$true] %s116_s14 }
  0x7b   :  { %s5508_s19 = scalar_lea.hbm %s5982_s6, 16 }
  0x7c   :  { %p5509_p0 = scmp.ne.s32.totalorder %s5982_s6, %s5508_s19  ;;  %p5512_p1 = scmp.lt.u32.totalorder %s5508_s19, %s5982_s6 }
  0x7e   :  { %p5514_p2 = pnand %p5512_p1, %p5509_p0 }
  0x80   :  { %5517 = shalt.err (!%p5514_p2)
}
  0x81   :  { %s5518_s4 = scalar_lea.vmem %s95_s12, 16  ;;  %s5522_s15 = scalar_lea.vmem %s95_s12, 32 }
  0x82   :  { %p5519_p3 = scmp.ne.s32.totalorder %s95_s12, %s5518_s4  ;;  %p5523_p4 = scmp.lt.s32.totalorder %s95_s12, %s95_s12 }
  0x83   :  { %p5524_p5 = scmp.lt.s32.totalorder %s5522_s15, %s5518_s4 }
  0x85   :  { %p5525_p6 = por %p5524_p5, %p5523_p4 }
  0x87   :  { %p5526_p7 = pnand %p5525_p6, %p5519_p3 }
  0x89   :  { %5529 = shalt.err (!%p5526_p7)
}
  0x8a   :  { %97 = dma.hbm_to_vmem [thread:$0]  %s5982_s6, 16, %s95_s12, [#allocation12]  }
  0x8b   :  { %s5530_s25 = scalar_lea.hbm %s5984_s8, 16 }
  0x8c   :  { %p5531_p8 = scmp.ne.s32.totalorder %s5984_s8, %s5530_s25  ;;  %p5534_p9 = scmp.lt.u32.totalorder %s5530_s25, %s5984_s8 }
  0x8e   :  { %p5536_p10 = pnand %p5534_p9, %p5531_p8 }
  0x90   :  { %5539 = shalt.err (!%p5536_p10)
}
  0x91   :  { %s5540_s7 = scalar_lea.vmem %s117_s14, 16  ;;  %s5544_s3 = scalar_lea.vmem %s117_s14, 32 }
  0x92   :  { %p5541_p11 = scmp.ne.s32.totalorder %s117_s14, %s5540_s7  ;;  %p5545_p12 = scmp.lt.s32.totalorder %s117_s14, %s117_s14 }
  0x93   :  { %p5546_p13 = scmp.lt.s32.totalorder %s5544_s3, %s5540_s7 }
  0x95   :  { %p5547_p0 = por %p5546_p13, %p5545_p12 }
  0x97   :  { %p5548_p1 = pnand %p5547_p0, %p5541_p11 }
  0x99   :  { %5551 = shalt.err (!%p5548_p1)
}
  0x9a   :  { %119 = dma.hbm_to_vmem [thread:$0]  %s5984_s8, 16, %s117_s14, [#allocation15]  }
  0x9b   :  { %5574 = dma.done.wait [#allocation3], 7168  }
  0x9c   :  { %5575 = vsyncadd [#allocation3], 4294960128 }
  0x9d   :  { %5576 = dma.done.wait [#allocation6], 28736  }
  0x9e   :  { %5577 = vsyncadd [#allocation6], 4294938560 }
  0x9f   :  { %5578 = dma.done.wait [#allocation9], 8224  }
  0xa0   :  { %5579 = vsyncadd [#allocation9], 4294959072 }
  0xa1   :  { %5580 = dma.done.wait [#allocation12], 2064  }
  0xa2   :  { %5581 = vsyncadd [#allocation12], 4294965232 }
  0xa3   :  { %5582 = dma.done.wait [#allocation15], 1040  }
  0xa4   :  { %5583 = vsyncadd [#allocation15], 4294966256  ;;  %v4818_v0 = vld [vmem:[#allocation5 + $0x4] ss:$16 sps:$4 sm:$0xff]   ;;  %v4820_v1 = vld [vmem:[#allocation5 + $0xc] ss:$16 sps:$4 sm:$0xff]  }
  0xa5   :  { %1866 = vmatprep.subr.bf16.mxu0 %v4818_v0  ;;  %v4822_v2 = vld [vmem:[#allocation5] ss:$16 sps:$4 sm:$0xff]   ;;  %v4823_v3 = vld [vmem:[#allocation5 + $0x8] ss:$16 sps:$4 sm:$0xff]   ;;  %2318 = vmatprep.subr.bf16.mxu1 %v4820_v1  ;;  %v4824_v4 = vld [vmem:[#allocation5 + $0x24] ss:$16 sps:$4 sm:$0xff]  }
  0xa6   :  { %1867 = vmatpush1.bf16.msra.mxu0 %v4822_v2  ;;  %2319 = vmatpush1.bf16.msra.mxu1 %v4823_v3  ;;  %v4826_v5 = vld [vmem:[#allocation5 + $0x2c] ss:$16 sps:$4 sm:$0xff]   ;;  %v4828_v6 = vld [vmem:[#allocation5 + $0x20] ss:$16 sps:$4 sm:$0xff]   ;;  %v4829_v7 = vld [vmem:[#allocation5 + $0x28] ss:$16 sps:$4 sm:$0xff]  }
  0xa7   :  { %1868 = vmatprep.subr.bf16.mxu0 %v4824_v4  ;;  %2320 = vmatprep.subr.bf16.mxu1 %v4826_v5  ;;  %v4830_v8 = vld [vmem:[#allocation5 + $0x44] ss:$16 sps:$4 sm:$0xff]   ;;  %v4832_v9 = vld [vmem:[#allocation5 + $0x4c] ss:$16 sps:$4 sm:$0xff]   ;;  %v4834_v10 = vld [vmem:[#allocation5 + $0x40] ss:$16 sps:$4 sm:$0xff]  }
  0xa8   :  { %v4835_v11 = vld [vmem:[#allocation5 + $0x48] ss:$16 sps:$4 sm:$0xff]   ;;  %v4836_v12 = vld [vmem:[#allocation5 + $0x64] ss:$16 sps:$4 sm:$0xff]   ;;  %v4838_v13 = vld [vmem:[#allocation5 + $0x6c] ss:$16 sps:$4 sm:$0xff]  }
  0xa9   :  { %v4840_v14 = vld [vmem:[#allocation5 + $0x60] ss:$16 sps:$4 sm:$0xff]   ;;  %v4841_v15 = vld [vmem:[#allocation5 + $0x68] ss:$16 sps:$4 sm:$0xff]   ;;  %v4842_v16 = vld [vmem:[#allocation5 + $0x84] ss:$16 sps:$4 sm:$0xff]  }
  0xaa   :  { %1869 = vmatpush1.bf16.msra.mxu0 %v4828_v6  ;;  %2321 = vmatpush1.bf16.msra.mxu1 %v4829_v7  ;;  %v4844_v17 = vld [vmem:[#allocation5 + $0x8c] ss:$16 sps:$4 sm:$0xff]   ;;  %v4846_v18 = vld [vmem:[#allocation5 + $0x80] ss:$16 sps:$4 sm:$0xff]   ;;  %v4847_v19 = vld [vmem:[#allocation5 + $0x88] ss:$16 sps:$4 sm:$0xff]  }
  0xab   :  { %1870 = vmatprep.subr.bf16.mxu0 %v4830_v8  ;;  %2322 = vmatprep.subr.bf16.mxu1 %v4832_v9  ;;  %v4848_v20 = vld [vmem:[#allocation5 + $0xa4] ss:$16 sps:$4 sm:$0xff]   ;;  %v4850_v21 = vld [vmem:[#allocation5 + $0xac] ss:$16 sps:$4 sm:$0xff]   ;;  %v4852_v22 = vld [vmem:[#allocation5 + $0xa0] ss:$16 sps:$4 sm:$0xff]  }
  0xac   :  { %v4853_v23 = vld [vmem:[#allocation5 + $0xa8] ss:$16 sps:$4 sm:$0xff]   ;;  %v4854_v24 = vld [vmem:[#allocation5 + $0xc4] ss:$16 sps:$4 sm:$0xff]   ;;  %v4856_v25 = vld [vmem:[#allocation5 + $0xcc] ss:$16 sps:$4 sm:$0xff]  }
  0xad   :  { %v4858_v26 = vld [vmem:[#allocation5 + $0xc0] ss:$16 sps:$4 sm:$0xff]   ;;  %v4859_v27 = vld [vmem:[#allocation5 + $0xc8] ss:$16 sps:$4 sm:$0xff]   ;;  %v4860_v28 = vld [vmem:[#allocation5 + $0xe4] ss:$16 sps:$4 sm:$0xff]  }
  0xae   :  { %1871 = vmatpush1.bf16.msra.mxu0 %v4834_v10  ;;  %2323 = vmatpush1.bf16.msra.mxu1 %v4835_v11  ;;  %v4862_v29 = vld [vmem:[#allocation5 + $0xec] ss:$16 sps:$4 sm:$0xff]   ;;  %v4864_v30 = vld [vmem:[#allocation5 + $0xe0] ss:$16 sps:$4 sm:$0xff]   ;;  %v4865_v31 = vld [vmem:[#allocation5 + $0xe8] ss:$16 sps:$4 sm:$0xff]  }
  0xaf   :  { %1872 = vmatprep.subr.bf16.mxu0 %v4836_v12  ;;  %2324 = vmatprep.subr.bf16.mxu1 %v4838_v13  ;;  %v4866_v32 = vld [vmem:[#allocation5 + $0x104] ss:$16 sps:$4 sm:$0xff]   ;;  %v4868_v33 = vld [vmem:[#allocation5 + $0x10c] ss:$16 sps:$4 sm:$0xff]   ;;  %v4870_v34 = vld [vmem:[#allocation5 + $0x100] ss:$16 sps:$4 sm:$0xff]  }
  0xb0   :  { %v4871_v35 = vld [vmem:[#allocation5 + $0x108] ss:$16 sps:$4 sm:$0xff]   ;;  %v4872_v36 = vld [vmem:[#allocation5 + $0x124] ss:$16 sps:$4 sm:$0xff]   ;;  %v4874_v37 = vld [vmem:[#allocation5 + $0x12c] ss:$16 sps:$4 sm:$0xff]  }
  0xb1   :  { %v4876_v38 = vld [vmem:[#allocation5 + $0x120] ss:$16 sps:$4 sm:$0xff]   ;;  %v4877_v39 = vld [vmem:[#allocation5 + $0x128] ss:$16 sps:$4 sm:$0xff]   ;;  %v4878_v40 = vld [vmem:[#allocation5 + $0x144] ss:$16 sps:$4 sm:$0xff]  }
  0xb2   :  { %1873 = vmatpush1.bf16.msra.mxu0 %v4840_v14  ;;  %2325 = vmatpush1.bf16.msra.mxu1 %v4841_v15  ;;  %v4880_v41 = vld [vmem:[#allocation5 + $0x14c] ss:$16 sps:$4 sm:$0xff]   ;;  %v4882_v42 = vld [vmem:[#allocation5 + $0x140] ss:$16 sps:$4 sm:$0xff]   ;;  %v4883_v43 = vld [vmem:[#allocation5 + $0x148] ss:$16 sps:$4 sm:$0xff]  }
  0xb3   :  { %1874 = vmatprep.subr.bf16.mxu0 %v4842_v16  ;;  %2326 = vmatprep.subr.bf16.mxu1 %v4844_v17  ;;  %v4884_v44 = vld [vmem:[#allocation5 + $0x164] ss:$16 sps:$4 sm:$0xff]   ;;  %v4886_v45 = vld [vmem:[#allocation5 + $0x16c] ss:$16 sps:$4 sm:$0xff]   ;;  %v4888_v46 = vld [vmem:[#allocation5 + $0x160] ss:$16 sps:$4 sm:$0xff]  }
  0xb4   :  { %v4889_v47 = vld [vmem:[#allocation5 + $0x168] ss:$16 sps:$4 sm:$0xff]   ;;  %v4916_v48 = vld [vmem:[#allocation2 + $0x4] ss:$28 sps:$4 sm:$0xff]   ;;  %v4892_v50 = vld [vmem:[#allocation5 + $0x18c] ss:$16 sps:$4 sm:$0xff]  }
  0xb5   :  { %v4890_v49 = vld [vmem:[#allocation5 + $0x184] ss:$16 sps:$4 sm:$0xff]   ;;  %1898 = vmatprep.mubr.bf16.mxu0 %v4916_v48  ;;  %2350 = vmatprep.mubr.bf16.mxu1 %v4916_v48  ;;  %v4894_v51 = vld [vmem:[#allocation5 + $0x180] ss:$16 sps:$4 sm:$0xff]   ;;  %v4895_v52 = vld [vmem:[#allocation5 + $0x188] ss:$16 sps:$4 sm:$0xff]  }
  0xb6   :  { %1875 = vmatpush1.bf16.msra.mxu0 %v4846_v18  ;;  %2327 = vmatpush1.bf16.msra.mxu1 %v4847_v19  ;;  %v4896_v53 = vld [vmem:[#allocation5 + $0x1a4] ss:$16 sps:$4 sm:$0xff]   ;;  %v4898_v54 = vld [vmem:[#allocation5 + $0x1ac] ss:$16 sps:$4 sm:$0xff]   ;;  %v4900_v55 = vld [vmem:[#allocation5 + $0x1a0] ss:$16 sps:$4 sm:$0xff]  }
  0xb7   :  { %1876 = vmatprep.subr.bf16.mxu0 %v4848_v20  ;;  %2328 = vmatprep.subr.bf16.mxu1 %v4850_v21  ;;  %v4901_v56 = vld [vmem:[#allocation5 + $0x1a8] ss:$16 sps:$4 sm:$0xff]   ;;  %v4902_v57 = vld [vmem:[#allocation5 + $0x1c4] ss:$16 sps:$4 sm:$0xff]   ;;  %v4904_v58 = vld [vmem:[#allocation5 + $0x1cc] ss:$16 sps:$4 sm:$0xff]  }
  0xb8   :  { %v4906_v59 = vld [vmem:[#allocation5 + $0x1c0] ss:$16 sps:$4 sm:$0xff]   ;;  %v4907_v60 = vld [vmem:[#allocation5 + $0x1c8] ss:$16 sps:$4 sm:$0xff]   ;;  %v4908_v61 = vld [vmem:[#allocation5 + $0x1e4] ss:$16 sps:$4 sm:$0xff]  }
  0xb9   :  { %v4910_v62 = vld [vmem:[#allocation5 + $0x1ec] ss:$16 sps:$4 sm:$0xff]   ;;  %v4912_v63 = vld [vmem:[#allocation5 + $0x1e0] ss:$16 sps:$4 sm:$0xff]   ;;  %v4913_v0 = vld [vmem:[#allocation5 + $0x1e8] ss:$16 sps:$4 sm:$0xff]  }
  0xba   :  { %1877 = vmatpush1.bf16.msra.mxu0 %v4852_v22  ;;  %2329 = vmatpush1.bf16.msra.mxu1 %v4853_v23  ;;  %v4919_v1 = vld [vmem:[#allocation5 + $0x204] ss:$16 sps:$4 sm:$0xff]   ;;  %v4922_v2 = vld [vmem:[#allocation5 + $0x20c] ss:$16 sps:$4 sm:$0xff]   ;;  %v4917_v4 = vld [vmem:[#allocation5 + $0x200] ss:$16 sps:$4 sm:$0xff]  }
  0xbb   :  { %1878 = vmatprep.subr.bf16.mxu0 %v4854_v24  ;;  %2330 = vmatprep.subr.bf16.mxu1 %v4856_v25  ;;  %v4914_v3 = vld [vmem:[#allocation2] ss:$28 sps:$4 sm:$0xff]   ;;  %v4920_v5 = vld [vmem:[#allocation5 + $0x208] ss:$16 sps:$4 sm:$0xff]   ;;  %v4925_v6 = vld [vmem:[#allocation5 + $0x224] ss:$16 sps:$4 sm:$0xff]  }
  0xbc   :  { %v4928_v7 = vld [vmem:[#allocation5 + $0x22c] ss:$16 sps:$4 sm:$0xff]   ;;  %v4923_v9 = vld [vmem:[#allocation5 + $0x220] ss:$16 sps:$4 sm:$0xff]   ;;  %v4926_v10 = vld [vmem:[#allocation5 + $0x228] ss:$16 sps:$4 sm:$0xff]  }
  0xbd   :  { %v4929_v8 = vld [vmem:[#allocation2 + $0x3c] ss:$28 sps:$4 sm:$0xff]   ;;  %v4934_v11 = vld [vmem:[#allocation5 + $0x244] ss:$16 sps:$4 sm:$0xff]   ;;  %v4932_v14 = vld [vmem:[#allocation5 + $0x240] ss:$16 sps:$4 sm:$0xff]  }
  0xbe   :  { %1879 = vmatpush1.bf16.msra.mxu0 %v4858_v26  ;;  %2331 = vmatpush1.bf16.msra.mxu1 %v4859_v27  ;;  %v4937_v12 = vld [vmem:[#allocation5 + $0x24c] ss:$16 sps:$4 sm:$0xff]   ;;  %v4931_v13 = vld [vmem:[#allocation2 + $0x38] ss:$28 sps:$4 sm:$0xff]   ;;  %v4938_v19 = vld [vmem:[#allocation5 + $0x260] ss:$16 sps:$4 sm:$0xff]  }
  0xbf   :  { %1880 = vmatprep.subr.bf16.mxu0 %v4860_v28  ;;  %2332 = vmatprep.subr.bf16.mxu1 %v4862_v29  ;;  %v4935_v15 = vld [vmem:[#allocation5 + $0x248] ss:$16 sps:$4 sm:$0xff]   ;;  %v4940_v16 = vld [vmem:[#allocation5 + $0x264] ss:$16 sps:$4 sm:$0xff]   ;;  %v4943_v17 = vld [vmem:[#allocation5 + $0x26c] ss:$16 sps:$4 sm:$0xff]  }
  0xc0   :  { %v4944_v18 = vld [vmem:[#allocation2 + $0x74] ss:$28 sps:$4 sm:$0xff]   ;;  %v4941_v20 = vld [vmem:[#allocation5 + $0x268] ss:$16 sps:$4 sm:$0xff]   ;;  %v4952_v22 = vld [vmem:[#allocation5 + $0x28c] ss:$16 sps:$4 sm:$0xff]  }
  0xc1   :  { %v4949_v21 = vld [vmem:[#allocation5 + $0x284] ss:$16 sps:$4 sm:$0xff]   ;;  %v4946_v23 = vld [vmem:[#allocation2 + $0x70] ss:$28 sps:$4 sm:$0xff]   ;;  %v4950_v25 = vld [vmem:[#allocation5 + $0x288] ss:$16 sps:$4 sm:$0xff]  }
  0xc2   :  { %1881 = vmatpush1.bf16.msra.mxu0 %v4864_v30  ;;  %2333 = vmatpush1.bf16.msra.mxu1 %v4865_v31  ;;  %v4947_v24 = vld [vmem:[#allocation5 + $0x280] ss:$16 sps:$4 sm:$0xff]   ;;  %v4955_v26 = vld [vmem:[#allocation5 + $0x2a4] ss:$16 sps:$4 sm:$0xff]   ;;  %v4958_v27 = vld [vmem:[#allocation5 + $0x2ac] ss:$16 sps:$4 sm:$0xff]  }
  0xc3   :  { %1882 = vmatprep.subr.bf16.mxu0 %v4866_v32  ;;  %2334 = vmatprep.subr.bf16.mxu1 %v4868_v33  ;;  %v4959_v28 = vld [vmem:[#allocation2 + $0xac] ss:$28 sps:$4 sm:$0xff]   ;;  %v4953_v29 = vld [vmem:[#allocation5 + $0x2a0] ss:$16 sps:$4 sm:$0xff]   ;;  %v4964_v31 = vld [vmem:[#allocation5 + $0x2c4] ss:$16 sps:$4 sm:$0xff]  }
  0xc4   :  { %v4956_v30 = vld [vmem:[#allocation5 + $0x2a8] ss:$16 sps:$4 sm:$0xff]   ;;  %v4967_v32 = vld [vmem:[#allocation5 + $0x2cc] ss:$16 sps:$4 sm:$0xff]   ;;  %s5604_s8 = smov [#allocation17]  }
  0xc5   :  { %v4961_v33 = vld [vmem:[#allocation2 + $0xa8] ss:$28 sps:$4 sm:$0xff]   ;;  %v4989_v48 = vld [vmem:[#allocation2 + $0x11c] ss:$28 sps:$4 sm:$0xff]   ;;  %s3981_s24 = sshll.u32 %s5604_s8, 4  ;;  %s3982_s24 = int_to_ptr.vmem [resolvable:$true] %s3981_s24 }
  0xc6   :  { %1883 = vmatpush1.bf16.msra.mxu0 %v4870_v34  ;;  %2335 = vmatpush1.bf16.msra.mxu1 %v4871_v35  ;;  %v4962_v34 = vld [vmem:[#allocation5 + $0x2c0] ss:$16 sps:$4 sm:$0xff]   ;;  %v4965_v35 = vld [vmem:[#allocation5 + $0x2c8] ss:$16 sps:$4 sm:$0xff]   ;;  %s5552_s29 = scalar_lea.vmem %s3982_s24, 2048  ;;  %p5557_p3 = scmp.lt.s32.totalorder %s3982_s24, %s3982_s24 }
  0xc7   :  { %1884 = vmatprep.subr.bf16.mxu0 %v4872_v36  ;;  %2336 = vmatprep.subr.bf16.mxu1 %v4874_v37  ;;  %v4970_v36 = vld [vmem:[#allocation5 + $0x2e4] ss:$16 sps:$4 sm:$0xff]   ;;  %v4973_v37 = vld [vmem:[#allocation5 + $0x2ec] ss:$16 sps:$4 sm:$0xff]   ;;  %p5553_p2 = scmp.ne.s32.totalorder %s3982_s24, %s5552_s29  ;;  %p5558_p4 = scmp.lt.s32.totalorder %s5552_s29, %s5552_s29 }
  0xc9   :  { %p5559_p5 = por %p5558_p4, %p5557_p3 }
  0xca   :  { %1885 = vmatpush1.bf16.msra.mxu0 %v4876_v38  ;;  %2337 = vmatpush1.bf16.msra.mxu1 %v4877_v39  ;;  %v4974_v38 = vld [vmem:[#allocation2 + $0xe4] ss:$28 sps:$4 sm:$0xff]  }
  0xcb   :  { %1886 = vmatprep.subr.bf16.mxu0 %v4878_v40  ;;  %2338 = vmatprep.subr.bf16.mxu1 %v4880_v41  ;;  %v4968_v39 = vld [vmem:[#allocation5 + $0x2e0] ss:$16 sps:$4 sm:$0xff]   ;;  %v4971_v40 = vld [vmem:[#allocation5 + $0x2e8] ss:$16 sps:$4 sm:$0xff]   ;;  %v4979_v41 = vld [vmem:[#allocation5 + $0x304] ss:$16 sps:$4 sm:$0xff]   ;;  %p5560_p6 = pnand %p5559_p5, %p5553_p2 }
  0xce   :  { %1887 = vmatpush1.bf16.msra.mxu0 %v4882_v42  ;;  %2339 = vmatpush1.bf16.msra.mxu1 %v4883_v43  ;;  %v4982_v42 = vld [vmem:[#allocation5 + $0x30c] ss:$16 sps:$4 sm:$0xff]  }
  0xcf   :  { %1888 = vmatprep.subr.bf16.mxu0 %v4884_v44  ;;  %2340 = vmatprep.subr.bf16.mxu1 %v4886_v45  ;;  %v4976_v43 = vld [vmem:[#allocation2 + $0xe0] ss:$28 sps:$4 sm:$0xff]   ;;  %v4980_v45 = vld [vmem:[#allocation5 + $0x308] ss:$16 sps:$4 sm:$0xff]  }
  0xd0   :  { %v4977_v44 = vld [vmem:[#allocation5 + $0x300] ss:$16 sps:$4 sm:$0xff]  }
  0xd2   :  { %1889 = vmatpush1.bf16.msra.mxu0 %v4888_v46  ;;  %2341 = vmatpush1.bf16.msra.mxu1 %v4889_v47  ;;  %v4985_v46 = vld [vmem:[#allocation5 + $0x324] ss:$16 sps:$4 sm:$0xff]   ;;  %v4988_v47 = vld [vmem:[#allocation5 + $0x32c] ss:$16 sps:$4 sm:$0xff]  }
  0xd3   :  { %1890 = vmatprep.subr.bf16.mxu0 %v4890_v49  ;;  %2342 = vmatprep.subr.bf16.mxu1 %v4892_v50  ;;  %v4983_v49 = vld [vmem:[#allocation5 + $0x320] ss:$16 sps:$4 sm:$0xff]   ;;  %v4986_v50 = vld [vmem:[#allocation5 + $0x328] ss:$16 sps:$4 sm:$0xff]  }
  0xd6   :  { %1891 = vmatpush1.bf16.msra.mxu0 %v4894_v51  ;;  %2343 = vmatpush1.bf16.msra.mxu1 %v4895_v52  ;;  %v4994_v51 = vld [vmem:[#allocation5 + $0x344] ss:$16 sps:$4 sm:$0xff]   ;;  %v4997_v52 = vld [vmem:[#allocation5 + $0x34c] ss:$16 sps:$4 sm:$0xff]  }
  0xd7   :  { %1892 = vmatprep.subr.bf16.mxu0 %v4896_v53  ;;  %2344 = vmatprep.subr.bf16.mxu1 %v4898_v54  ;;  %v4991_v53 = vld [vmem:[#allocation2 + $0x118] ss:$28 sps:$4 sm:$0xff]   ;;  %v4992_v54 = vld [vmem:[#allocation5 + $0x340] ss:$16 sps:$4 sm:$0xff]  }
  0xda   :  { %1893 = vmatpush1.bf16.msra.mxu0 %v4900_v55  ;;  %2345 = vmatpush1.bf16.msra.mxu1 %v4901_v56  ;;  %v4995_v55 = vld [vmem:[#allocation5 + $0x348] ss:$16 sps:$4 sm:$0xff]   ;;  %v5000_v56 = vld [vmem:[#allocation5 + $0x364] ss:$16 sps:$4 sm:$0xff]  }
  0xdb   :  { %1894 = vmatprep.subr.bf16.mxu0 %v4902_v57  ;;  %2346 = vmatprep.subr.bf16.mxu1 %v4904_v58  ;;  %v5003_v57 = vld [vmem:[#allocation5 + $0x36c] ss:$16 sps:$4 sm:$0xff]   ;;  %v5004_v58 = vld [vmem:[#allocation2 + $0x154] ss:$28 sps:$4 sm:$0xff]  }
  0xde   :  { %1895 = vmatpush1.bf16.msra.mxu0 %v4906_v59  ;;  %2347 = vmatpush1.bf16.msra.mxu1 %v4907_v60  ;;  %v4998_v59 = vld [vmem:[#allocation5 + $0x360] ss:$16 sps:$4 sm:$0xff]   ;;  %v5001_v60 = vld [vmem:[#allocation5 + $0x368] ss:$16 sps:$4 sm:$0xff]  }
  0xdf   :  { %1896 = vmatprep.subr.bf16.mxu0 %v4908_v61  ;;  %2348 = vmatprep.subr.bf16.mxu1 %v4910_v62  ;;  %v5009_v61 = vld [vmem:[#allocation5 + $0x384] ss:$16 sps:$4 sm:$0xff]   ;;  %v5012_v62 = vld [vmem:[#allocation5 + $0x38c] ss:$16 sps:$4 sm:$0xff]  }
  0xe2   :  { %1897 = vmatpush1.bf16.msra.mxu0 %v4912_v63  ;;  %2349 = vmatpush1.bf16.msra.mxu1 %v4913_v0  ;;  %v5006_v63 = vld [vmem:[#allocation2 + $0x150] ss:$28 sps:$4 sm:$0xff]  }
  0xe3   :  { %1979 = vmatprep.subr.bf16.mxu0 %v4919_v1  ;;  %2431 = vmatprep.subr.bf16.mxu1 %v4922_v2  ;;  %v5007_v0 = vld [vmem:[#allocation5 + $0x380] ss:$16 sps:$4 sm:$0xff]   ;;  %v5010_v1 = vld [vmem:[#allocation5 + $0x388] ss:$16 sps:$4 sm:$0xff]   ;;  %v5015_v2 = vld [vmem:[#allocation5 + $0x3a4] ss:$16 sps:$4 sm:$0xff]  }
  0xe5   :  { %1899 = vmatmul.mubr.bf16.vlgmr.msra.gmra.mrb[0].mxu0 %v4914_v3  ;;  %2351 = vmatmul.mubr.bf16.vlgmr.msra.gmra.mrb[0].mxu1 %v4914_v3  ;;  %v5018_v3 = vld [vmem:[#allocation5 + $0x3ac] ss:$16 sps:$4 sm:$0xff]  }
  0xe6   :  { %1980 = vmatpush1.bf16.msra.mxu0 %v4917_v4  ;;  %2432 = vmatpush1.bf16.msra.mxu1 %v4920_v5  ;;  %v5019_v4 = vld [vmem:[#allocation2 + $0x18c] ss:$28 sps:$4 sm:$0xff]   ;;  %v5013_v5 = vld [vmem:[#allocation5 + $0x3a0] ss:$16 sps:$4 sm:$0xff]  }
  0xe7   :  { %1981 = vmatprep.subr.bf16.mxu0 %v4925_v6  ;;  %2433 = vmatprep.subr.bf16.mxu1 %v4928_v7  ;;  %v5016_v6 = vld [vmem:[#allocation5 + $0x3a8] ss:$16 sps:$4 sm:$0xff]   ;;  %v5024_v7 = vld [vmem:[#allocation5 + $0x3c4] ss:$16 sps:$4 sm:$0xff]  }
  0xe8   :  { %1908 = vmatprep.mubr.bf16.mxu0 %v4929_v8  ;;  %2360 = vmatprep.mubr.bf16.mxu1 %v4929_v8  ;;  %v5027_v8 = vld [vmem:[#allocation5 + $0x3cc] ss:$16 sps:$4 sm:$0xff]  }
  0xea   :  { %1982 = vmatpush1.bf16.msra.mxu0 %v4923_v9  ;;  %2434 = vmatpush1.bf16.msra.mxu1 %v4926_v10  ;;  %v5021_v9 = vld [vmem:[#allocation2 + $0x188] ss:$28 sps:$4 sm:$0xff]   ;;  %v5022_v10 = vld [vmem:[#allocation5 + $0x3c0] ss:$16 sps:$4 sm:$0xff]  }
  0xeb   :  { %1983 = vmatprep.subr.bf16.mxu0 %v4934_v11  ;;  %2435 = vmatprep.subr.bf16.mxu1 %v4937_v12  ;;  %v5025_v11 = vld [vmem:[#allocation5 + $0x3c8] ss:$16 sps:$4 sm:$0xff]   ;;  %v5030_v12 = vld [vmem:[#allocation5 + $0x3e4] ss:$16 sps:$4 sm:$0xff]  }
  0xed   :  { %1909 = vmatmul.mubr.bf16.gmra.mrb[4].mxu0 %v4931_v13  ;;  %2361 = vmatmul.mubr.bf16.gmra.mrb[4].mxu1 %v4931_v13  ;;  %v5033_v13 = vld [vmem:[#allocation5 + $0x3ec] ss:$16 sps:$4 sm:$0xff]  }
  0xee   :  { %1984 = vmatpush1.bf16.msra.mxu0 %v4932_v14  ;;  %2436 = vmatpush1.bf16.msra.mxu1 %v4935_v15  ;;  %v5036_v14 = vld [vmem:[#allocation2 + $0xc] ss:$28 sps:$4 sm:$0xff]   ;;  %v5028_v15 = vld [vmem:[#allocation5 + $0x3e0] ss:$16 sps:$4 sm:$0xff]  }
  0xef   :  { %1985 = vmatprep.subr.bf16.mxu0 %v4940_v16  ;;  %2437 = vmatprep.subr.bf16.mxu1 %v4943_v17  ;;  %v5031_v16 = vld [vmem:[#allocation5 + $0x3e8] ss:$16 sps:$4 sm:$0xff]   ;;  %v5039_v17 = vld [vmem:[#allocation5 + $0x404] ss:$16 sps:$4 sm:$0xff]  }
  0xf0   :  { %1918 = vmatprep.mubr.bf16.mxu0 %v4944_v18  ;;  %2370 = vmatprep.mubr.bf16.mxu1 %v4944_v18  ;;  %v5042_v18 = vld [vmem:[#allocation5 + $0x40c] ss:$16 sps:$4 sm:$0xff]  }
  0xf2   :  { %1986 = vmatpush1.bf16.msra.mxu0 %v4938_v19  ;;  %2438 = vmatpush1.bf16.msra.mxu1 %v4941_v20  ;;  %v5034_v19 = vld [vmem:[#allocation2 + $0x8] ss:$28 sps:$4 sm:$0xff]   ;;  %v5037_v20 = vld [vmem:[#allocation5 + $0x400] ss:$16 sps:$4 sm:$0xff]  }
  0xf3   :  { %1987 = vmatprep.subr.bf16.mxu0 %v4949_v21  ;;  %2439 = vmatprep.subr.bf16.mxu1 %v4952_v22  ;;  %v5040_v21 = vld [vmem:[#allocation5 + $0x408] ss:$16 sps:$4 sm:$0xff]   ;;  %v5045_v22 = vld [vmem:[#allocation5 + $0x424] ss:$16 sps:$4 sm:$0xff]  }
  0xf5   :  { %1919 = vmatmul.mubr.bf16.gmra.mrb[8].mxu0 %v4946_v23  ;;  %2371 = vmatmul.mubr.bf16.gmra.mrb[8].mxu1 %v4946_v23  ;;  %v5048_v23 = vld [vmem:[#allocation5 + $0x42c] ss:$16 sps:$4 sm:$0xff]  }
  0xf6   :  { %1988 = vmatpush1.bf16.msra.mxu0 %v4947_v24  ;;  %2440 = vmatpush1.bf16.msra.mxu1 %v4950_v25  ;;  %v5049_v24 = vld [vmem:[#allocation2 + $0x44] ss:$28 sps:$4 sm:$0xff]  }
  0xf7   :  { %1989 = vmatprep.subr.bf16.mxu0 %v4955_v26  ;;  %2441 = vmatprep.subr.bf16.mxu1 %v4958_v27  ;;  %v5043_v25 = vld [vmem:[#allocation5 + $0x420] ss:$16 sps:$4 sm:$0xff]   ;;  %v5046_v26 = vld [vmem:[#allocation5 + $0x428] ss:$16 sps:$4 sm:$0xff]   ;;  %v5054_v27 = vld [vmem:[#allocation5 + $0x444] ss:$16 sps:$4 sm:$0xff]  }
  0xf8   :  { %1928 = vmatprep.mubr.bf16.mxu0 %v4959_v28  ;;  %2380 = vmatprep.mubr.bf16.mxu1 %v4959_v28  ;;  %v5057_v28 = vld [vmem:[#allocation5 + $0x44c] ss:$16 sps:$4 sm:$0xff]  }
  0xfa   :  { %1990 = vmatpush1.bf16.msra.mxu0 %v4953_v29  ;;  %2442 = vmatpush1.bf16.msra.mxu1 %v4956_v30  ;;  %v5051_v29 = vld [vmem:[#allocation2 + $0x40] ss:$28 sps:$4 sm:$0xff]  }
  0xfb   :  { %1991 = vmatprep.subr.bf16.mxu0 %v4964_v31  ;;  %2443 = vmatprep.subr.bf16.mxu1 %v4967_v32  ;;  %v5052_v30 = vld [vmem:[#allocation5 + $0x440] ss:$16 sps:$4 sm:$0xff]   ;;  %v5055_v31 = vld [vmem:[#allocation5 + $0x448] ss:$16 sps:$4 sm:$0xff]   ;;  %v5060_v32 = vld [vmem:[#allocation5 + $0x464] ss:$16 sps:$4 sm:$0xff]  }
  0xfd   :  { %1929 = vmatmul.mubr.bf16.gmra.mrb[12].mxu0 %v4961_v33  ;;  %2381 = vmatmul.mubr.bf16.gmra.mrb[12].mxu1 %v4961_v33  ;;  %v5063_v33 = vld [vmem:[#allocation5 + $0x46c] ss:$16 sps:$4 sm:$0xff]  }
  0xfe   :  { %1992 = vmatpush1.bf16.msra.mxu0 %v4962_v34  ;;  %2444 = vmatpush1.bf16.msra.mxu1 %v4965_v35  ;;  %v5064_v34 = vld [vmem:[#allocation2 + $0x7c] ss:$28 sps:$4 sm:$0xff]   ;;  %v5058_v35 = vld [vmem:[#allocation5 + $0x460] ss:$16 sps:$4 sm:$0xff]  }
  0xff   :  { %1993 = vmatprep.subr.bf16.mxu0 %v4970_v36  ;;  %2445 = vmatprep.subr.bf16.mxu1 %v4973_v37  ;;  %v5061_v36 = vld [vmem:[#allocation5 + $0x468] ss:$16 sps:$4 sm:$0xff]   ;;  %v5069_v37 = vld [vmem:[#allocation5 + $0x484] ss:$16 sps:$4 sm:$0xff]  }
 0x100   :  { %1938 = vmatprep.mubr.bf16.mxu0 %v4974_v38  ;;  %2390 = vmatprep.mubr.bf16.mxu1 %v4974_v38  ;;  %v5072_v38 = vld [vmem:[#allocation5 + $0x48c] ss:$16 sps:$4 sm:$0xff]  }
 0x102   :  { %1994 = vmatpush1.bf16.msra.mxu0 %v4968_v39  ;;  %2446 = vmatpush1.bf16.msra.mxu1 %v4971_v40  ;;  %v5066_v39 = vld [vmem:[#allocation2 + $0x78] ss:$28 sps:$4 sm:$0xff]   ;;  %v5067_v40 = vld [vmem:[#allocation5 + $0x480] ss:$16 sps:$4 sm:$0xff]  }
 0x103   :  { %1995 = vmatprep.subr.bf16.mxu0 %v4979_v41  ;;  %2447 = vmatprep.subr.bf16.mxu1 %v4982_v42  ;;  %v5070_v41 = vld [vmem:[#allocation5 + $0x488] ss:$16 sps:$4 sm:$0xff]   ;;  %v5075_v42 = vld [vmem:[#allocation5 + $0x4a4] ss:$16 sps:$4 sm:$0xff]  }
 0x105   :  { %1939 = vmatmul.mubr.bf16.gmra.mrb[16].mxu0 %v4976_v43  ;;  %2391 = vmatmul.mubr.bf16.gmra.mrb[16].mxu1 %v4976_v43  ;;  %v5078_v43 = vld [vmem:[#allocation5 + $0x4ac] ss:$16 sps:$4 sm:$0xff]  }
 0x106   :  { %1996 = vmatpush1.bf16.msra.mxu0 %v4977_v44  ;;  %2448 = vmatpush1.bf16.msra.mxu1 %v4980_v45  ;;  %v5079_v44 = vld [vmem:[#allocation2 + $0xb4] ss:$28 sps:$4 sm:$0xff]  }
 0x107   :  { %1997 = vmatprep.subr.bf16.mxu0 %v4985_v46  ;;  %2449 = vmatprep.subr.bf16.mxu1 %v4988_v47  ;;  %v5073_v45 = vld [vmem:[#allocation5 + $0x4a0] ss:$16 sps:$4 sm:$0xff]   ;;  %v5076_v46 = vld [vmem:[#allocation5 + $0x4a8] ss:$16 sps:$4 sm:$0xff]   ;;  %v5084_v47 = vld [vmem:[#allocation5 + $0x4c4] ss:$16 sps:$4 sm:$0xff]  }
 0x108   :  { %1948 = vmatprep.mubr.bf16.mxu0 %v4989_v48  ;;  %2400 = vmatprep.mubr.bf16.mxu1 %v4989_v48  ;;  %v5087_v48 = vld [vmem:[#allocation5 + $0x4cc] ss:$16 sps:$4 sm:$0xff]  }
 0x10a   :  { %1998 = vmatpush1.bf16.msra.mxu0 %v4983_v49  ;;  %2450 = vmatpush1.bf16.msra.mxu1 %v4986_v50  ;;  %v5081_v49 = vld [vmem:[#allocation2 + $0xb0] ss:$28 sps:$4 sm:$0xff]  }
 0x10b   :  { %1999 = vmatprep.subr.bf16.mxu0 %v4994_v51  ;;  %2451 = vmatprep.subr.bf16.mxu1 %v4997_v52  ;;  %v5082_v50 = vld [vmem:[#allocation5 + $0x4c0] ss:$16 sps:$4 sm:$0xff]   ;;  %v5085_v51 = vld [vmem:[#allocation5 + $0x4c8] ss:$16 sps:$4 sm:$0xff]   ;;  %v5090_v52 = vld [vmem:[#allocation5 + $0x4e4] ss:$16 sps:$4 sm:$0xff]  }
 0x10d   :  { %1949 = vmatmul.mubr.bf16.gmra.mrb[20].mxu0 %v4991_v53  ;;  %2401 = vmatmul.mubr.bf16.gmra.mrb[20].mxu1 %v4991_v53  ;;  %v5093_v53 = vld [vmem:[#allocation5 + $0x4ec] ss:$16 sps:$4 sm:$0xff]  }
 0x10e   :  { %2000 = vmatpush1.bf16.msra.mxu0 %v4992_v54  ;;  %2452 = vmatpush1.bf16.msra.mxu1 %v4995_v55  ;;  %v5094_v54 = vld [vmem:[#allocation2 + $0xec] ss:$28 sps:$4 sm:$0xff]   ;;  %v5088_v55 = vld [vmem:[#allocation5 + $0x4e0] ss:$16 sps:$4 sm:$0xff]  }
 0x10f   :  { %2001 = vmatprep.subr.bf16.mxu0 %v5000_v56  ;;  %2453 = vmatprep.subr.bf16.mxu1 %v5003_v57  ;;  %v5091_v56 = vld [vmem:[#allocation5 + $0x4e8] ss:$16 sps:$4 sm:$0xff]   ;;  %v5099_v57 = vld [vmem:[#allocation5 + $0x504] ss:$16 sps:$4 sm:$0xff]  }
 0x110   :  { %1958 = vmatprep.mubr.bf16.mxu0 %v5004_v58  ;;  %2410 = vmatprep.mubr.bf16.mxu1 %v5004_v58  ;;  %v5102_v58 = vld [vmem:[#allocation5 + $0x50c] ss:$16 sps:$4 sm:$0xff]  }
 0x112   :  { %2002 = vmatpush1.bf16.msra.mxu0 %v4998_v59  ;;  %2454 = vmatpush1.bf16.msra.mxu1 %v5001_v60  ;;  %v5096_v59 = vld [vmem:[#allocation2 + $0xe8] ss:$28 sps:$4 sm:$0xff]   ;;  %v5097_v60 = vld [vmem:[#allocation5 + $0x500] ss:$16 sps:$4 sm:$0xff]  }
 0x113   :  { %2003 = vmatprep.subr.bf16.mxu0 %v5009_v61  ;;  %2455 = vmatprep.subr.bf16.mxu1 %v5012_v62  ;;  %v5100_v61 = vld [vmem:[#allocation5 + $0x508] ss:$16 sps:$4 sm:$0xff]   ;;  %v5105_v62 = vld [vmem:[#allocation5 + $0x524] ss:$16 sps:$4 sm:$0xff]  }
 0x115   :  { %1959 = vmatmul.mubr.bf16.gmra.mrb[24].mxu0 %v5006_v63  ;;  %2411 = vmatmul.mubr.bf16.gmra.mrb[24].mxu1 %v5006_v63  ;;  %v5108_v63 = vld [vmem:[#allocation5 + $0x52c] ss:$16 sps:$4 sm:$0xff]  }
 0x116   :  { %2004 = vmatpush1.bf16.msra.mxu0 %v5007_v0  ;;  %2456 = vmatpush1.bf16.msra.mxu1 %v5010_v1  ;;  %v5109_v0 = vld [vmem:[#allocation2 + $0x124] ss:$28 sps:$4 sm:$0xff]  }
 0x117   :  { %2005 = vmatprep.subr.bf16.mxu0 %v5015_v2  ;;  %2457 = vmatprep.subr.bf16.mxu1 %v5018_v3  ;;  %v5103_v1 = vld [vmem:[#allocation5 + $0x520] ss:$16 sps:$4 sm:$0xff]   ;;  %v5106_v2 = vld [vmem:[#allocation5 + $0x528] ss:$16 sps:$4 sm:$0xff]   ;;  %v5114_v3 = vld [vmem:[#allocation5 + $0x544] ss:$16 sps:$4 sm:$0xff]  }
 0x118   :  { %1968 = vmatprep.mubr.bf16.mxu0 %v5019_v4  ;;  %2420 = vmatprep.mubr.bf16.mxu1 %v5019_v4  ;;  %v5117_v4 = vld [vmem:[#allocation5 + $0x54c] ss:$16 sps:$4 sm:$0xff]  }
 0x11a   :  { %2006 = vmatpush1.bf16.msra.mxu0 %v5013_v5  ;;  %2458 = vmatpush1.bf16.msra.mxu1 %v5016_v6  ;;  %v5111_v5 = vld [vmem:[#allocation2 + $0x120] ss:$28 sps:$4 sm:$0xff]  }
 0x11b   :  { %2007 = vmatprep.subr.bf16.mxu0 %v5024_v7  ;;  %2459 = vmatprep.subr.bf16.mxu1 %v5027_v8  ;;  %v5112_v6 = vld [vmem:[#allocation5 + $0x540] ss:$16 sps:$4 sm:$0xff]   ;;  %v5115_v7 = vld [vmem:[#allocation5 + $0x548] ss:$16 sps:$4 sm:$0xff]   ;;  %v5120_v8 = vld [vmem:[#allocation5 + $0x564] ss:$16 sps:$4 sm:$0xff]  }
 0x11d   :  { %1969 = vmatmul.mubr.bf16.gmra.mrb[28].mxu0 %v5021_v9  ;;  %2421 = vmatmul.mubr.bf16.gmra.mrb[28].mxu1 %v5021_v9  ;;  %v5123_v9 = vld [vmem:[#allocation5 + $0x56c] ss:$16 sps:$4 sm:$0xff]  }
 0x11e   :  { %2008 = vmatpush1.bf16.msra.mxu0 %v5022_v10  ;;  %2460 = vmatpush1.bf16.msra.mxu1 %v5025_v11  ;;  %v5124_v10 = vld [vmem:[#allocation2 + $0x15c] ss:$28 sps:$4 sm:$0xff]   ;;  %v5118_v11 = vld [vmem:[#allocation5 + $0x560] ss:$16 sps:$4 sm:$0xff]  }
 0x11f   :  { %2009 = vmatprep.subr.bf16.mxu0 %v5030_v12  ;;  %2461 = vmatprep.subr.bf16.mxu1 %v5033_v13  ;;  %v5121_v12 = vld [vmem:[#allocation5 + $0x568] ss:$16 sps:$4 sm:$0xff]   ;;  %v5129_v13 = vld [vmem:[#allocation5 + $0x584] ss:$16 sps:$4 sm:$0xff]  }
 0x120   :  { %2011 = vmatprep.mubr.bf16.mxu0 %v5036_v14  ;;  %2463 = vmatprep.mubr.bf16.mxu1 %v5036_v14  ;;  %v5132_v14 = vld [vmem:[#allocation5 + $0x58c] ss:$16 sps:$4 sm:$0xff]  }
 0x122   :  { %2010 = vmatpush1.bf16.msra.mxu0 %v5028_v15  ;;  %2462 = vmatpush1.bf16.msra.mxu1 %v5031_v16  ;;  %v5126_v15 = vld [vmem:[#allocation2 + $0x158] ss:$28 sps:$4 sm:$0xff]   ;;  %v5127_v16 = vld [vmem:[#allocation5 + $0x580] ss:$16 sps:$4 sm:$0xff]  }
 0x123   :  { %2092 = vmatprep.subr.bf16.mxu0 %v5039_v17  ;;  %2544 = vmatprep.subr.bf16.mxu1 %v5042_v18  ;;  %v5130_v17 = vld [vmem:[#allocation5 + $0x588] ss:$16 sps:$4 sm:$0xff]   ;;  %v5135_v18 = vld [vmem:[#allocation5 + $0x5a4] ss:$16 sps:$4 sm:$0xff]  }
 0x125   :  { %2012 = vmatmul.mubr.bf16.vlgmr.msra.gmra.mrb[0].mxu0 %v5034_v19  ;;  %2464 = vmatmul.mubr.bf16.vlgmr.msra.gmra.mrb[0].mxu1 %v5034_v19  ;;  %v5138_v19 = vld [vmem:[#allocation5 + $0x5ac] ss:$16 sps:$4 sm:$0xff]  }
 0x126   :  { %2093 = vmatpush1.bf16.msra.mxu0 %v5037_v20  ;;  %2545 = vmatpush1.bf16.msra.mxu1 %v5040_v21  ;;  %v5139_v20 = vld [vmem:[#allocation2 + $0x194] ss:$28 sps:$4 sm:$0xff]  }
 0x127   :  { %2094 = vmatprep.subr.bf16.mxu0 %v5045_v22  ;;  %2546 = vmatprep.subr.bf16.mxu1 %v5048_v23  ;;  %v5133_v21 = vld [vmem:[#allocation5 + $0x5a0] ss:$16 sps:$4 sm:$0xff]   ;;  %v5136_v22 = vld [vmem:[#allocation5 + $0x5a8] ss:$16 sps:$4 sm:$0xff]   ;;  %v5144_v23 = vld [vmem:[#allocation5 + $0x5c4] ss:$16 sps:$4 sm:$0xff]  }
 0x128   :  { %2021 = vmatprep.mubr.bf16.mxu0 %v5049_v24  ;;  %2473 = vmatprep.mubr.bf16.mxu1 %v5049_v24  ;;  %v5141_v24 = vld [vmem:[#allocation2 + $0x190] ss:$28 sps:$4 sm:$0xff]  }
 0x12a   :  { %2095 = vmatpush1.bf16.msra.mxu0 %v5043_v25  ;;  %2547 = vmatpush1.bf16.msra.mxu1 %v5046_v26  ;;  %v5147_v25 = vld [vmem:[#allocation5 + $0x5cc] ss:$16 sps:$4 sm:$0xff]   ;;  %v5142_v26 = vld [vmem:[#allocation5 + $0x5c0] ss:$16 sps:$4 sm:$0xff]  }
 0x12b   :  { %2096 = vmatprep.subr.bf16.mxu0 %v5054_v27  ;;  %2548 = vmatprep.subr.bf16.mxu1 %v5057_v28  ;;  %v5145_v27 = vld [vmem:[#allocation5 + $0x5c8] ss:$16 sps:$4 sm:$0xff]   ;;  %v5150_v28 = vld [vmem:[#allocation5 + $0x5e4] ss:$16 sps:$4 sm:$0xff]  }
 0x12d   :  { %2022 = vmatmul.mubr.bf16.gmra.mrb[4].mxu0 %v5051_v29  ;;  %2474 = vmatmul.mubr.bf16.gmra.mrb[4].mxu1 %v5051_v29  ;;  %v5153_v29 = vld [vmem:[#allocation5 + $0x5ec] ss:$16 sps:$4 sm:$0xff]  }
 0x12e   :  { %2097 = vmatpush1.bf16.msra.mxu0 %v5052_v30  ;;  %2549 = vmatpush1.bf16.msra.mxu1 %v5055_v31  ;;  %v5148_v30 = vld [vmem:[#allocation5 + $0x5e0] ss:$16 sps:$4 sm:$0xff]  }
 0x12f   :  { %2098 = vmatprep.subr.bf16.mxu0 %v5060_v32  ;;  %2550 = vmatprep.subr.bf16.mxu1 %v5063_v33  ;;  %v5156_v31 = vld [vmem:[#allocation2 + $0x14] ss:$28 sps:$4 sm:$0xff]   ;;  %v5151_v32 = vld [vmem:[#allocation5 + $0x5e8] ss:$16 sps:$4 sm:$0xff]  }
 0x130   :  { %2031 = vmatprep.mubr.bf16.mxu0 %v5064_v34  ;;  %2483 = vmatprep.mubr.bf16.mxu1 %v5064_v34  ;;  %v5159_v33 = vld [vmem:[#allocation5 + $0x604] ss:$16 sps:$4 sm:$0xff]   ;;  %v5186_v34 = vld [vmem:[#allocation5 + $0x60c] ss:$16 sps:$4 sm:$0xff]  }
 0x132   :  { %2099 = vmatpush1.bf16.msra.mxu0 %v5058_v35  ;;  %2551 = vmatpush1.bf16.msra.mxu1 %v5061_v36  ;;  %v5154_v35 = vld [vmem:[#allocation2 + $0x10] ss:$28 sps:$4 sm:$0xff]  }
 0x133   :  { %2100 = vmatprep.subr.bf16.mxu0 %v5069_v37  ;;  %2552 = vmatprep.subr.bf16.mxu1 %v5072_v38  ;;  %v5157_v36 = vld [vmem:[#allocation5 + $0x600] ss:$16 sps:$4 sm:$0xff]   ;;  %v5160_v37 = vld [vmem:[#allocation2 + $0x4c] ss:$28 sps:$4 sm:$0xff]   ;;  %v5165_v38 = vld [vmem:[#allocation5 + $0x624] ss:$16 sps:$4 sm:$0xff]  }
 0x135   :  { %2032 = vmatmul.mubr.bf16.gmra.mrb[8].mxu0 %v5066_v39  ;;  %2484 = vmatmul.mubr.bf16.gmra.mrb[8].mxu1 %v5066_v39  ;;  %v5184_v39 = vld [vmem:[#allocation5 + $0x608] ss:$16 sps:$4 sm:$0xff]  }
 0x136   :  { %2101 = vmatpush1.bf16.msra.mxu0 %v5067_v40  ;;  %2553 = vmatpush1.bf16.msra.mxu1 %v5070_v41  ;;  %v5189_v40 = vld [vmem:[#allocation5 + $0x62c] ss:$16 sps:$4 sm:$0xff]   ;;  %v5163_v41 = vld [vmem:[#allocation5 + $0x620] ss:$16 sps:$4 sm:$0xff]  }
 0x137   :  { %2102 = vmatprep.subr.bf16.mxu0 %v5075_v42  ;;  %2554 = vmatprep.subr.bf16.mxu1 %v5078_v43  ;;  %v5171_v42 = vld [vmem:[#allocation5 + $0x644] ss:$16 sps:$4 sm:$0xff]   ;;  %v5187_v43 = vld [vmem:[#allocation5 + $0x628] ss:$16 sps:$4 sm:$0xff]  }
 0x138   :  { %2041 = vmatprep.mubr.bf16.mxu0 %v5079_v44  ;;  %2493 = vmatprep.mubr.bf16.mxu1 %v5079_v44  ;;  %v5162_v44 = vld [vmem:[#allocation2 + $0x48] ss:$28 sps:$4 sm:$0xff]  }
 0x13a   :  { %2103 = vmatpush1.bf16.msra.mxu0 %v5073_v45  ;;  %2555 = vmatpush1.bf16.msra.mxu1 %v5076_v46  ;;  %v5166_v45 = vld [vmem:[#allocation2 + $0x84] ss:$28 sps:$4 sm:$0xff]  }
 0x13b   :  { %2104 = vmatprep.subr.bf16.mxu0 %v5084_v47  ;;  %2556 = vmatprep.subr.bf16.mxu1 %v5087_v48  ;;  %v5169_v46 = vld [vmem:[#allocation5 + $0x640] ss:$16 sps:$4 sm:$0xff]   ;;  %v5198_v47 = vld [vmem:[#allocation5 + $0x64c] ss:$16 sps:$4 sm:$0xff]   ;;  %v5177_v48 = vld [vmem:[#allocation5 + $0x664] ss:$16 sps:$4 sm:$0xff]  }
 0x13d   :  { %2042 = vmatmul.mubr.bf16.gmra.mrb[12].mxu0 %v5081_v49  ;;  %2494 = vmatmul.mubr.bf16.gmra.mrb[12].mxu1 %v5081_v49  ;;  %v5196_v49 = vld [vmem:[#allocation5 + $0x648] ss:$16 sps:$4 sm:$0xff]  }
 0x13e   :  { %2105 = vmatpush1.bf16.msra.mxu0 %v5082_v50  ;;  %2557 = vmatpush1.bf16.msra.mxu1 %v5085_v51  ;;  %v5201_v50 = vld [vmem:[#allocation5 + $0x66c] ss:$16 sps:$4 sm:$0xff]  }
 0x13f   :  { %2106 = vmatprep.subr.bf16.mxu0 %v5090_v52  ;;  %2558 = vmatprep.subr.bf16.mxu1 %v5093_v53  ;;  %v5168_v51 = vld [vmem:[#allocation2 + $0x80] ss:$28 sps:$4 sm:$0xff]   ;;  %v5183_v53 = vld [vmem:[#allocation5 + $0x684] ss:$16 sps:$4 sm:$0xff]  }
 0x140   :  { %2051 = vmatprep.mubr.bf16.mxu0 %v5094_v54  ;;  %2503 = vmatprep.mubr.bf16.mxu1 %v5094_v54  ;;  %v5175_v52 = vld [vmem:[#allocation5 + $0x660] ss:$16 sps:$4 sm:$0xff]   ;;  %v5199_v54 = vld [vmem:[#allocation5 + $0x668] ss:$16 sps:$4 sm:$0xff]  }
 0x142   :  { %2107 = vmatpush1.bf16.msra.mxu0 %v5088_v55  ;;  %2559 = vmatpush1.bf16.msra.mxu1 %v5091_v56  ;;  %v5172_v55 = vld [vmem:[#allocation2 + $0xbc] ss:$28 sps:$4 sm:$0xff]   ;;  %v5181_v56 = vld [vmem:[#allocation5 + $0x680] ss:$16 sps:$4 sm:$0xff]  }
 0x143   :  { %2108 = vmatprep.subr.bf16.mxu0 %v5099_v57  ;;  %2560 = vmatprep.subr.bf16.mxu1 %v5102_v58  ;;  %v5195_v57 = vld [vmem:[#allocation5 + $0x6a4] ss:$16 sps:$4 sm:$0xff]   ;;  %v5208_v58 = vld [vmem:[#allocation5 + $0x688] ss:$16 sps:$4 sm:$0xff]  }
 0x145   :  { %2052 = vmatmul.mubr.bf16.gmra.mrb[16].mxu0 %v5096_v59  ;;  %2504 = vmatmul.mubr.bf16.gmra.mrb[16].mxu1 %v5096_v59  ;;  %v5210_v59 = vld [vmem:[#allocation5 + $0x68c] ss:$16 sps:$4 sm:$0xff]  }
 0x146   :  { %2109 = vmatpush1.bf16.msra.mxu0 %v5097_v60  ;;  %2561 = vmatpush1.bf16.msra.mxu1 %v5100_v61  ;;  %v5213_v60 = vld [vmem:[#allocation5 + $0x6ac] ss:$16 sps:$4 sm:$0xff]   ;;  %v5193_v61 = vld [vmem:[#allocation5 + $0x6a0] ss:$16 sps:$4 sm:$0xff]  }
 0x147   :  { %2110 = vmatprep.subr.bf16.mxu0 %v5105_v62  ;;  %2562 = vmatprep.subr.bf16.mxu1 %v5108_v63  ;;  %v5207_v62 = vld [vmem:[#allocation5 + $0x6c4] ss:$16 sps:$4 sm:$0xff]   ;;  %v5211_v63 = vld [vmem:[#allocation5 + $0x6a8] ss:$16 sps:$4 sm:$0xff]  }
 0x148   :  { %2061 = vmatprep.mubr.bf16.mxu0 %v5109_v0  ;;  %2513 = vmatprep.mubr.bf16.mxu1 %v5109_v0  ;;  %v5174_v0 = vld [vmem:[#allocation2 + $0xb8] ss:$28 sps:$4 sm:$0xff]  }
 0x14a   :  { %2111 = vmatpush1.bf16.msra.mxu0 %v5103_v1  ;;  %2563 = vmatpush1.bf16.msra.mxu1 %v5106_v2  ;;  %v5178_v1 = vld [vmem:[#allocation2 + $0xf4] ss:$28 sps:$4 sm:$0xff]  }
 0x14b   :  { %2112 = vmatprep.subr.bf16.mxu0 %v5114_v3  ;;  %2564 = vmatprep.subr.bf16.mxu1 %v5117_v4  ;;  %v5205_v2 = vld [vmem:[#allocation5 + $0x6c0] ss:$16 sps:$4 sm:$0xff]   ;;  %v5222_v3 = vld [vmem:[#allocation5 + $0x6cc] ss:$16 sps:$4 sm:$0xff]   ;;  %v5219_v4 = vld [vmem:[#allocation5 + $0x6e4] ss:$16 sps:$4 sm:$0xff]  }
 0x14d   :  { %2062 = vmatmul.mubr.bf16.gmra.mrb[20].mxu0 %v5111_v5  ;;  %2514 = vmatmul.mubr.bf16.gmra.mrb[20].mxu1 %v5111_v5  ;;  %v5220_v5 = vld [vmem:[#allocation5 + $0x6c8] ss:$16 sps:$4 sm:$0xff]  }
 0x14e   :  { %2113 = vmatpush1.bf16.msra.mxu0 %v5112_v6  ;;  %2565 = vmatpush1.bf16.msra.mxu1 %v5115_v7  ;;  %v5225_v6 = vld [vmem:[#allocation5 + $0x6ec] ss:$16 sps:$4 sm:$0xff]   ;;  %v5217_v7 = vld [vmem:[#allocation5 + $0x6e0] ss:$16 sps:$4 sm:$0xff]  }
 0x14f   :  { %2114 = vmatprep.subr.bf16.mxu0 %v5120_v8  ;;  %2566 = vmatprep.subr.bf16.mxu1 %v5123_v9  ;;  %v5223_v8 = vld [vmem:[#allocation5 + $0x6e8] ss:$16 sps:$4 sm:$0xff]  }
 0x150   :  { %2071 = vmatprep.mubr.bf16.mxu0 %v5124_v10  ;;  %2523 = vmatprep.mubr.bf16.mxu1 %v5124_v10  ;;  %v5236_v9 = vld [vmem:[#allocation8 + $0x4] ss:$8 sps:$4 sm:$0xff]  }
 0x151   :  { %v5180_v10 = vld [vmem:[#allocation2 + $0xf0] ss:$28 sps:$4 sm:$0xff]  }
 0x152   :  { %2115 = vmatpush1.bf16.msra.mxu0 %v5118_v11  ;;  %2567 = vmatpush1.bf16.msra.mxu1 %v5121_v12  ;;  %v5190_v11 = vld [vmem:[#allocation2 + $0x12c] ss:$28 sps:$4 sm:$0xff]  }
 0x153   :  { %2116 = vmatprep.subr.bf16.mxu0 %v5129_v13  ;;  %2568 = vmatprep.subr.bf16.mxu1 %v5132_v14  ;;  %v5192_v12 = vld [vmem:[#allocation2 + $0x128] ss:$28 sps:$4 sm:$0xff]   ;;  %v5204_v14 = vld [vmem:[#allocation2 + $0x160] ss:$28 sps:$4 sm:$0xff]  }
 0x154   :  { %v5202_v13 = vld [vmem:[#allocation2 + $0x164] ss:$28 sps:$4 sm:$0xff]  }
 0x155   :  { %2072 = vmatmul.mubr.bf16.gmra.mrb[24].mxu0 %v5126_v15  ;;  %2524 = vmatmul.mubr.bf16.gmra.mrb[24].mxu1 %v5126_v15  ;;  %v5214_v15 = vld [vmem:[#allocation2 + $0x19c] ss:$28 sps:$4 sm:$0xff]  }
 0x156   :  { %2117 = vmatpush1.bf16.msra.mxu0 %v5127_v16  ;;  %2569 = vmatpush1.bf16.msra.mxu1 %v5130_v17  ;;  %v5216_v16 = vld [vmem:[#allocation2 + $0x198] ss:$28 sps:$4 sm:$0xff]   ;;  %v5603_v17 = vmov 0  }
 0x157   :  { %2118 = vmatprep.subr.bf16.mxu0 %v5135_v18  ;;  %2570 = vmatprep.subr.bf16.mxu1 %v5138_v19  ;;  %v5226_v18 = vld [vmem:[#allocation2 + $0x18] ss:$28 sps:$4 sm:$0xff]   ;;  %v5234_v19 = vld [vmem:[#allocation8] ss:$8 sps:$4 sm:$0xff]  }
 0x158   :  { %2081 = vmatprep.mubr.bf16.mxu0 %v5139_v20  ;;  %2533 = vmatprep.mubr.bf16.mxu1 %v5139_v20  ;;  %v5239_v20 = vld [vmem:[#allocation8 + $0x14] ss:$8 sps:$4 sm:$0xff]  }
 0x15a   :  { %2119 = vmatpush1.bf16.msra.mxu0 %v5133_v21  ;;  %2571 = vmatpush1.bf16.msra.mxu1 %v5136_v22  ;;  %v5237_v21 = vld [vmem:[#allocation8 + $0x10] ss:$8 sps:$4 sm:$0xff]   ;;  %v5242_v22 = vld [vmem:[#allocation8 + $0x24] ss:$8 sps:$4 sm:$0xff]  }
 0x15b   :  { %2120 = vmatprep.subr.bf16.mxu0 %v5144_v23  ;;  %2572 = vmatprep.subr.bf16.mxu1 %v5147_v25  ;;  %v5227_v23 = vld [vmem:[#allocation2 + $0x50] ss:$28 sps:$4 sm:$0xff]   ;;  %v5245_v25 = vld [vmem:[#allocation8 + $0x34] ss:$8 sps:$4 sm:$0xff]  }
 0x15d   :  { %2082 = vmatmul.mubr.bf16.gmra.mrb[28].mxu0 %v5141_v24  ;;  %2534 = vmatmul.mubr.bf16.gmra.mrb[28].mxu1 %v5141_v24  ;;  %v5240_v24 = vld [vmem:[#allocation8 + $0x20] ss:$8 sps:$4 sm:$0xff]  }
 0x15e   :  { %2121 = vmatpush1.bf16.msra.mxu0 %v5142_v26  ;;  %2573 = vmatpush1.bf16.msra.mxu1 %v5145_v27  ;;  %v5243_v26 = vld [vmem:[#allocation8 + $0x30] ss:$8 sps:$4 sm:$0xff]   ;;  %v5248_v27 = vld [vmem:[#allocation8 + $0x44] ss:$8 sps:$4 sm:$0xff]  }
 0x15f   :  { %2122 = vmatprep.subr.bf16.mxu0 %v5150_v28  ;;  %2574 = vmatprep.subr.bf16.mxu1 %v5153_v29  ;;  %v5228_v28 = vld [vmem:[#allocation2 + $0x88] ss:$28 sps:$4 sm:$0xff]  }
 0x160   :  { %2124 = vmatprep.mubr.bf16.mxu0 %v5156_v31  ;;  %2576 = vmatprep.mubr.bf16.mxu1 %v5156_v31  ;;  %v5246_v29 = vld [vmem:[#allocation8 + $0x40] ss:$8 sps:$4 sm:$0xff]   ;;  %v5249_v31 = vld [vmem:[#allocation8 + $0x50] ss:$8 sps:$4 sm:$0xff]  }
 0x162   :  { %2123 = vmatpush1.bf16.msra.mxu0 %v5148_v30  ;;  %2575 = vmatpush1.bf16.msra.mxu1 %v5151_v32  ;;  %v5251_v30 = vld [vmem:[#allocation8 + $0x54] ss:$8 sps:$4 sm:$0xff]   ;;  %v5254_v32 = vld [vmem:[#allocation8 + $0x64] ss:$8 sps:$4 sm:$0xff]  }
 0x163   :  { %2205 = vmatprep.subr.bf16.mxu0 %v5159_v33  ;;  %2657 = vmatprep.subr.bf16.mxu1 %v5186_v34  ;;  %v5229_v33 = vld [vmem:[#allocation2 + $0xc0] ss:$28 sps:$4 sm:$0xff]   ;;  %v5252_v34 = vld [vmem:[#allocation8 + $0x60] ss:$8 sps:$4 sm:$0xff]  }
 0x165   :  { %2125 = vmatmul.mubr.bf16.vlgmr.msra.gmra.mrb[0].mxu0 %v5154_v35  ;;  %2577 = vmatmul.mubr.bf16.vlgmr.msra.gmra.mrb[0].mxu1 %v5154_v35  ;;  %v5257_v35 = vld [vmem:[#allocation8 + $0x74] ss:$8 sps:$4 sm:$0xff]  }
 0x166   :  { %2206 = vmatpush1.bf16.msra.mxu0 %v5157_v36  ;;  %2134 = vmatprep.mubr.bf16.mxu0 %v5160_v37  ;;  %v5255_v36 = vld [vmem:[#allocation8 + $0x70] ss:$8 sps:$4 sm:$0xff]  }
 0x167   :  { %2586 = vmatprep.mubr.bf16.mxu1 %v5160_v37  ;;  %2207 = vmatprep.subr.bf16.mxu0 %v5165_v38  ;;  %v5260_v37 = vld [vmem:[#allocation8 + $0x84] ss:$8 sps:$4 sm:$0xff]   ;;  %v5230_v38 = vld [vmem:[#allocation2 + $0xf8] ss:$28 sps:$4 sm:$0xff]  }
 0x168   :  { %2658 = vmatpush1.bf16.msra.mxu1 %v5184_v39  ;;  %v5258_v39 = vld [vmem:[#allocation8 + $0x80] ss:$8 sps:$4 sm:$0xff]  }
 0x169   :  { %2659 = vmatprep.subr.bf16.mxu1 %v5189_v40  ;;  %v5263_v40 = vld [vmem:[#allocation8 + $0x94] ss:$8 sps:$4 sm:$0xff]  }
 0x16a   :  { %2208 = vmatpush1.bf16.msra.mxu0 %v5163_v41  ;;  %v5261_v41 = vld [vmem:[#allocation8 + $0x90] ss:$8 sps:$4 sm:$0xff]  }
 0x16b   :  { %2209 = vmatprep.subr.bf16.mxu0 %v5171_v42  ;;  %v5266_v42 = vld [vmem:[#allocation8 + $0xa4] ss:$8 sps:$4 sm:$0xff]  }
 0x16c   :  { %2660 = vmatpush1.bf16.msra.mxu1 %v5187_v43  ;;  %v5231_v43 = vld [vmem:[#allocation2 + $0x130] ss:$28 sps:$4 sm:$0xff]  }
 0x16d   :  { %2135 = vmatmul.mubr.bf16.gmra.mrb[4].mxu0 %v5162_v44  ;;  %2587 = vmatmul.mubr.bf16.gmra.mrb[4].mxu1 %v5162_v44  ;;  %v5264_v44 = vld [vmem:[#allocation8 + $0xa0] ss:$8 sps:$4 sm:$0xff]  }
 0x16e   :  { %2144 = vmatprep.mubr.bf16.mxu0 %v5166_v45  ;;  %2596 = vmatprep.mubr.bf16.mxu1 %v5166_v45  ;;  %v5269_v45 = vld [vmem:[#allocation8 + $0xb4] ss:$8 sps:$4 sm:$0xff]  }
 0x16f   :  { %2210 = vmatpush1.bf16.msra.mxu0 %v5169_v46  ;;  %2661 = vmatprep.subr.bf16.mxu1 %v5198_v47  ;;  %v5267_v46 = vld [vmem:[#allocation8 + $0xb0] ss:$8 sps:$4 sm:$0xff]   ;;  %v5272_v47 = vld [vmem:[#allocation8 + $0xc4] ss:$8 sps:$4 sm:$0xff]  }
 0x170   :  { %2211 = vmatprep.subr.bf16.mxu0 %v5177_v48  ;;  %2662 = vmatpush1.bf16.msra.mxu1 %v5196_v49  ;;  %v5232_v48 = vld [vmem:[#allocation2 + $0x168] ss:$28 sps:$4 sm:$0xff]  }
 0x171   :  { %2663 = vmatprep.subr.bf16.mxu1 %v5201_v50  ;;  %v5270_v49 = vld [vmem:[#allocation8 + $0xc0] ss:$8 sps:$4 sm:$0xff]   ;;  %v5275_v50 = vld [vmem:[#allocation8 + $0xd4] ss:$8 sps:$4 sm:$0xff]  }
 0x173   :  { %2212 = vmatpush1.bf16.msra.mxu0 %v5175_v52  ;;  %v5233_v52 = vld [vmem:[#allocation2 + $0x1a0] ss:$28 sps:$4 sm:$0xff]  }
 0x174   :  { %2213 = vmatprep.subr.bf16.mxu0 %v5183_v53  ;;  %2664 = vmatpush1.bf16.msra.mxu1 %v5199_v54  ;;  %v5278_v53 = vld [vmem:[#allocation8 + $0xe4] ss:$8 sps:$4 sm:$0xff]   ;;  %v5276_v54 = vld [vmem:[#allocation8 + $0xe0] ss:$8 sps:$4 sm:$0xff]  }
 0x175   :  { %2145 = vmatmul.mubr.bf16.gmra.mrb[8].mxu0 %v5168_v51  ;;  %2597 = vmatmul.mubr.bf16.gmra.mrb[8].mxu1 %v5168_v51  ;;  %v5273_v51 = vld [vmem:[#allocation8 + $0xd0] ss:$8 sps:$4 sm:$0xff]  }
 0x176   :  { %2154 = vmatprep.mubr.bf16.mxu0 %v5172_v55  ;;  %2606 = vmatprep.mubr.bf16.mxu1 %v5172_v55  ;;  %v5281_v55 = vld [vmem:[#allocation8 + $0xf4] ss:$8 sps:$4 sm:$0xff]  }
 0x177   :  { %2214 = vmatpush1.bf16.msra.mxu0 %v5181_v56  ;;  %2665 = vmatprep.subr.bf16.mxu1 %v5210_v59  ;;  %v5279_v56 = vld [vmem:[#allocation8 + $0xf0] ss:$8 sps:$4 sm:$0xff]  }
 0x178   :  { %2215 = vmatprep.subr.bf16.mxu0 %v5195_v57  ;;  %2666 = vmatpush1.bf16.msra.mxu1 %v5208_v58  ;;  %v5284_v57 = vld [vmem:[#allocation8 + $0x104] ss:$8 sps:$4 sm:$0xff]   ;;  %v438_v58 = vlaneseq }
 0x179   :  { %2667 = vmatprep.subr.bf16.mxu1 %v5213_v60 }
 0x17a   :  { %v5782_v59 = vshrl.u32 %v438_v58, 7  ;;  %v5285_v58 = vld [vmem:[#allocation8 + $0x110] ss:$8 sps:$4 sm:$0xff]  }
 0x17b   :  { %2216 = vmatpush1.bf16.msra.mxu0 %v5193_v61 }
 0x17c   :  { %2217 = vmatprep.subr.bf16.mxu0 %v5207_v62  ;;  %2668 = vmatpush1.bf16.msra.mxu1 %v5211_v63  ;;  %v440_v60 = vsub.s32 0, %v5782_v59  ;;  %v448_v61 = vsub.s32 2, %v5782_v59  ;;  %v436_v62 = vld [vmem:[#allocation7] sm:$0xf]  ;;  %v444_v63 = vsub.s32 1, %v5782_v59 }
 0x17d   :  { %2155 = vmatmul.mubr.bf16.gmra.mrb[12].mxu0 %v5174_v0  ;;  %2607 = vmatmul.mubr.bf16.gmra.mrb[12].mxu1 %v5174_v0  ;;  %v452_v0 = vsub.s32 3, %v5782_v59 }
 0x17e   :  { %2164 = vmatprep.mubr.bf16.mxu0 %v5178_v1  ;;  %2616 = vmatprep.mubr.bf16.mxu1 %v5178_v1  ;;  %v5790_v1 = vrot.slane %v436_v62, %v440_v60 }
 0x17f   :  { %2218 = vmatpush1.bf16.msra.mxu0 %v5205_v2  ;;  %2669 = vmatprep.subr.bf16.mxu1 %v5222_v3  ;;  %v5792_v2 = vrot.slane %v436_v62, %v448_v61  ;;  %v5796_v3 = vrot.slane %v436_v62, %v444_v63 }
 0x180   :  { %2219 = vmatprep.subr.bf16.mxu0 %v5219_v4  ;;  %2670 = vmatpush1.bf16.msra.mxu1 %v5220_v5  ;;  %v5798_v4 = vrot.slane %v436_v62, %v452_v0 }
 0x181   :  { %2671 = vmatprep.subr.bf16.mxu1 %v5225_v6 }
 0x183   :  { %2220 = vmatpush1.bf16.msra.mxu0 %v5217_v7 }
 0x184   :  { %2672 = vmatpush1.bf16.msra.mxu1 %v5223_v8  ;;  %3262 = vmatprep.subr.bf16.mxu0 %v5236_v9 }
 0x185   :  { %2165 = vmatmul.mubr.bf16.gmra.mrb[16].mxu0 %v5180_v10  ;;  %2617 = vmatmul.mubr.bf16.gmra.mrb[16].mxu1 %v5180_v10 }
 0x186   :  { %2174 = vmatprep.mubr.bf16.mxu0 %v5190_v11  ;;  %2626 = vmatprep.mubr.bf16.mxu1 %v5190_v11 }
 0x18d   :  { %2175 = vmatmul.mubr.bf16.gmra.mrb[20].mxu0 %v5192_v12  ;;  %2627 = vmatmul.mubr.bf16.gmra.mrb[20].mxu1 %v5192_v12 }
 0x18e   :  { %2184 = vmatprep.mubr.bf16.mxu0 %v5202_v13  ;;  %2636 = vmatprep.mubr.bf16.mxu1 %v5202_v13 }
 0x195   :  { %2185 = vmatmul.mubr.bf16.gmra.mrb[24].mxu0 %v5204_v14  ;;  %2637 = vmatmul.mubr.bf16.gmra.mrb[24].mxu1 %v5204_v14 }
 0x196   :  { %2194 = vmatprep.mubr.bf16.mxu0 %v5214_v15  ;;  %2646 = vmatprep.mubr.bf16.mxu1 %v5214_v15 }
 0x19d   :  { %2195 = vmatmul.mubr.bf16.gmra.mrb[28].mxu0 %v5216_v16  ;;  %2647 = vmatmul.mubr.bf16.gmra.mrb[28].mxu1 %v5216_v16 }
 0x19e   :  { %2237 = vmatprep.mubr.bf16.mxu0 %v5603_v17  ;;  %2689 = vmatprep.mubr.bf16.mxu1 %v5603_v17 }
 0x1a5   :  { %2238 = vmatmul.mubr.bf16.vlgmr.msra.gmra.mrb[0].mxu0 %v5226_v18  ;;  %2690 = vmatmul.mubr.bf16.vlgmr.msra.gmra.mrb[0].mxu1 %v5226_v18 }
 0x1a6   :  { %2247 = vmatprep.mubr.bf16.mxu0 %v5603_v17  ;;  %2699 = vmatprep.mubr.bf16.mxu1 %v5603_v17 }
 0x1a7   :  { %3263 = vmatpush1.bf16.msra.mxu0 %v5234_v19  ;;  %v5330_v19 = vld [vmem:[#allocation11 + $0x40] sm:$0xff]  }
 0x1a8   :  { %3264 = vmatprep.subr.bf16.mxu0 %v5239_v20  ;;  %v5331_v20 = vld [vmem:[#allocation11] sm:$0xff]   ;;  %4367 = vmatprep.subr.bf16.mxu1 %v5330_v19 }
 0x1a9   :  { %4368 = vmatpush3.bf16.msra.mxu1 %v5331_v20  ;;  %v5288_v19 = vld [vmem:[#allocation8 + $0x120] ss:$8 sps:$4 sm:$0xff]  }
 0x1ab   :  { %3265 = vmatpush1.bf16.msra.mxu0 %v5237_v21 }
 0x1ac   :  { %3266 = vmatprep.subr.bf16.mxu0 %v5242_v22 }
 0x1ad   :  { %2248 = vmatmul.mubr.bf16.gmra.mrb[4].mxu0 %v5227_v23  ;;  %2700 = vmatmul.mubr.bf16.gmra.mrb[4].mxu1 %v5227_v23  ;;  %v5332_v23 = vld [vmem:[#allocation11 + $0x48] sm:$0xff]  }
 0x1ae   :  { %2257 = vmatprep.mubr.bf16.mxu0 %v5603_v17  ;;  %2709 = vmatprep.mubr.bf16.mxu1 %v5603_v17 }
 0x1af   :  { %3267 = vmatpush1.bf16.msra.mxu0 %v5240_v24  ;;  %4369 = vmatprep.subr.bf16.mxu1 %v5332_v23 }
 0x1b0   :  { %3268 = vmatprep.subr.bf16.mxu0 %v5245_v25 }
 0x1b3   :  { %3269 = vmatpush1.bf16.msra.mxu0 %v5243_v26 }
 0x1b4   :  { %3270 = vmatprep.subr.bf16.mxu0 %v5248_v27 }
 0x1b5   :  { %2258 = vmatmul.mubr.bf16.gmra.mrb[8].mxu0 %v5228_v28  ;;  %2710 = vmatmul.mubr.bf16.gmra.mrb[8].mxu1 %v5228_v28 }
 0x1b6   :  { %2267 = vmatprep.mubr.bf16.mxu0 %v5603_v17  ;;  %2719 = vmatprep.mubr.bf16.mxu1 %v5603_v17 }
 0x1b7   :  { %3271 = vmatpush1.bf16.msra.mxu0 %v5246_v29 }
 0x1b8   :  { %3272 = vmatprep.subr.bf16.mxu0 %v5251_v30 }
 0x1bb   :  { %3273 = vmatpush1.bf16.msra.mxu0 %v5249_v31 }
 0x1bc   :  { %3274 = vmatprep.subr.bf16.mxu0 %v5254_v32  ;;  %v5333_v32 = vld [vmem:[#allocation11 + $0x8] sm:$0xff]  }
 0x1bd   :  { %2268 = vmatmul.mubr.bf16.gmra.mrb[12].mxu0 %v5229_v33  ;;  %2720 = vmatmul.mubr.bf16.gmra.mrb[12].mxu1 %v5229_v33 }
 0x1be   :  { %2277 = vmatprep.mubr.bf16.mxu0 %v5603_v17  ;;  %2729 = vmatprep.mubr.bf16.mxu1 %v5603_v17 }
 0x1bf   :  { %3275 = vmatpush1.bf16.msra.mxu0 %v5252_v34  ;;  %4370 = vmatpush3.bf16.msra.mxu1 %v5333_v32 }
 0x1c0   :  { %3276 = vmatprep.subr.bf16.mxu0 %v5257_v35  ;;  %v5334_v35 = vld [vmem:[#allocation11 + $0x50] sm:$0xff]  }
 0x1c1   :  { %4371 = vmatprep.subr.bf16.mxu1 %v5334_v35  ;;  %v5340_v35 = vld [vmem:[#allocation11 + $0x68] sm:$0xff]  }
 0x1c3   :  { %3277 = vmatpush1.bf16.msra.mxu0 %v5255_v36 }
 0x1c4   :  { %3278 = vmatprep.subr.bf16.mxu0 %v5260_v37 }
 0x1c5   :  { %2278 = vmatmul.mubr.bf16.gmra.mrb[16].mxu0 %v5230_v38  ;;  %2730 = vmatmul.mubr.bf16.gmra.mrb[16].mxu1 %v5230_v38 }
 0x1c6   :  { %2287 = vmatprep.mubr.bf16.mxu0 %v5603_v17  ;;  %2739 = vmatprep.mubr.bf16.mxu1 %v5603_v17 }
 0x1c7   :  { %3279 = vmatpush1.bf16.msra.mxu0 %v5258_v39 }
 0x1c8   :  { %3280 = vmatprep.subr.bf16.mxu0 %v5263_v40  ;;  %v5282_v40 = vld [vmem:[#allocation8 + $0x100] ss:$8 sps:$4 sm:$0xff]  }
 0x1cb   :  { %3281 = vmatpush1.bf16.msra.mxu0 %v5261_v41 }
 0x1cc   :  { %3282 = vmatprep.subr.bf16.mxu0 %v5266_v42 }
 0x1cd   :  { %2288 = vmatmul.mubr.bf16.gmra.mrb[20].mxu0 %v5231_v43  ;;  %2740 = vmatmul.mubr.bf16.gmra.mrb[20].mxu1 %v5231_v43 }
 0x1ce   :  { %2297 = vmatprep.mubr.bf16.mxu0 %v5603_v17  ;;  %2749 = vmatprep.mubr.bf16.mxu1 %v5603_v17 }
 0x1cf   :  { %3283 = vmatpush1.bf16.msra.mxu0 %v5264_v44 }
 0x1d0   :  { %3284 = vmatprep.subr.bf16.mxu0 %v5269_v45  ;;  %v5287_v45 = vld [vmem:[#allocation8 + $0x114] ss:$8 sps:$4 sm:$0xff]  }
 0x1d3   :  { %3285 = vmatpush1.bf16.msra.mxu0 %v5267_v46 }
 0x1d4   :  { %3286 = vmatprep.subr.bf16.mxu0 %v5272_v47 }
 0x1d5   :  { %2298 = vmatmul.mubr.bf16.gmra.mrb[24].mxu0 %v5232_v48  ;;  %2750 = vmatmul.mubr.bf16.gmra.mrb[24].mxu1 %v5232_v48 }
 0x1d6   :  { %2307 = vmatprep.mubr.bf16.mxu0 %v5603_v17  ;;  %2759 = vmatprep.mubr.bf16.mxu1 %v5603_v17 }
 0x1d7   :  { %3287 = vmatpush1.bf16.msra.mxu0 %v5270_v49 }
 0x1d8   :  { %3288 = vmatprep.subr.bf16.mxu0 %v5275_v50  ;;  %v5335_v50 = vld [vmem:[#allocation11 + $0x10] sm:$0xff]  }
 0x1d9   :  { %4372 = vmatpush3.bf16.msra.mxu1 %v5335_v50 }
 0x1db   :  { %3289 = vmatpush1.bf16.msra.mxu0 %v5273_v51 }
 0x1dc   :  { %3290 = vmatprep.subr.bf16.mxu0 %v5278_v53 }
 0x1dd   :  { %2308 = vmatmul.mubr.bf16.gmra.mrb[28].mxu0 %v5233_v52  ;;  %2760 = vmatmul.mubr.bf16.gmra.mrb[28].mxu1 %v5233_v52 }
 0x1df   :  { %3291 = vmatpush1.bf16.msra.mxu0 %v5276_v54 }
 0x1e0   :  { %3292 = vmatprep.subr.bf16.mxu0 %v5281_v55  ;;  %v5336_v55 = vld [vmem:[#allocation11 + $0x58] sm:$0xff]  }
 0x1e1   :  { %4373 = vmatprep.subr.bf16.mxu1 %v5336_v55 }
 0x1e3   :  { %3293 = vmatpush1.bf16.msra.mxu0 %v5279_v56 }
 0x1e4   :  { %3375 = vmatprep.subr.bf16.mxu0 %v5284_v57 }
 0x278   :  { %v2239_v5 = vpop.f32.mrb[0].mxu0  ;;  %v2691_v6 = vpop.f32.mrb[0].mxu1 }
 0x279   :  { %v4479_v7 = vadd.f32 %v2239_v5, %v5790_v1  ;;  %v4511_v8 = vadd.f32 %v2691_v6, %v5792_v2  ;;  %v2241_v9 = vpop.f32.mrb[1].mxu0  ;;  %v2693_v10 = vpop.f32.mrb[1].mxu1  ;;  %v5290_v6 = vld [vmem:[#allocation8 + $0x124] ss:$8 sps:$4 sm:$0xff]  }
 0x27a   :  { %v4480_v11 = vadd.f32 %v2241_v9, %v5796_v3  ;;  %v4512_v12 = vadd.f32 %v2693_v10, %v5798_v4  ;;  %v2243_v13 = vpop.f32.mrb[2].mxu0  ;;  %v2695_v14 = vpop.f32.mrb[2].mxu1 }
 0x27b   :  { %v4481_v15 = vadd.f32 %v2243_v13, %v5790_v1  ;;  %v4513_v16 = vadd.f32 %v2695_v14, %v5792_v2  ;;  %v2245_v17 = vpop.f32.mrb[3].mxu0  ;;  %v2697_v18 = vpop.f32.mrb[3].mxu1  ;;  %v2770_v24 = vmax.f32 %v4479_v7, 0.0  ;;  %v2772_v25 = vmax.f32 %v4511_v8, 0.0  ;;  %v5338_v14 = vld [vmem:[#allocation11 + $0x60] sm:$0xff]  }
 0x27c   :  { %v4482_v21 = vadd.f32 %v2245_v17, %v5796_v3  ;;  %v4514_v22 = vadd.f32 %v2697_v18, %v5798_v4  ;;  %v2771_v28 = vmax.f32 %v4480_v11, 0.0  ;;  %v2773_v29 = vmax.f32 %v4512_v12, 0.0  ;;  %v5337_v11 = vld [vmem:[#allocation11 + $0x18] sm:$0xff]  }
 0x27d   :  { %v2774_v26 = vmax.f32 %v4481_v15, 0.0  ;;  %v2776_v27 = vmax.f32 %v4513_v16, 0.0  ;;  %4374 = vmatpush3.bf16.msra.mxu1 %v5337_v11 }
 0x27e   :  { %v2775_v30 = vmax.f32 %v4482_v21, 0.0  ;;  %v2777_v31 = vmax.f32 %v4514_v22, 0.0  ;;  %4375 = vmatprep.subr.bf16.mxu1 %v5338_v14 }
 0x27f   :  { %v2834_v33 = vpack.c.bf16 %v2774_v26, %v2770_v24  ;;  %v5808_v34 = vpack.c.bf16 %v2776_v27, %v2772_v25  ;;  %v5293_v24 = vld [vmem:[#allocation8 + $0x134] ss:$8 sps:$4 sm:$0xff]  }
 0x280   :  { %v2835_v36 = vpack.c.bf16 %v2775_v30, %v2771_v28  ;;  %v5810_v37 = vpack.c.bf16 %v2777_v31, %v2773_v29  ;;  %v2249_v38 = vpop.f32.mrb[4].mxu0  ;;  %v2701_v39 = vpop.f32.mrb[4].mxu1  ;;  %v5339_v29 = vld [vmem:[#allocation11 + $0x20] sm:$0xff]  }
 0x281   :  { %v4483_v41 = vadd.f32 %v2249_v38, %v5790_v1  ;;  %v4515_v42 = vadd.f32 %v2701_v39, %v5792_v2  ;;  %v2251_v43 = vpop.f32.mrb[5].mxu0  ;;  %v2703_v44 = vpop.f32.mrb[5].mxu1  ;;  %v5291_v39 = vld [vmem:[#allocation8 + $0x130] ss:$8 sps:$4 sm:$0xff]   ;;  %4376 = vmatpush3.bf16.msra.mxu1 %v5339_v29 }
 0x282   :  { %v4484_v46 = vadd.f32 %v2251_v43, %v5796_v3  ;;  %v4516_v47 = vadd.f32 %v2703_v44, %v5798_v4  ;;  %v2253_v48 = vpop.f32.mrb[6].mxu0  ;;  %v2705_v49 = vpop.f32.mrb[6].mxu1  ;;  %3294 = vmatprep.mubr.bf16.mxu0 %v2835_v36  ;;  %v5296_v44 = vld [vmem:[#allocation8 + $0x144] ss:$8 sps:$4 sm:$0xff]   ;;  %4377 = vmatprep.subr.bf16.mxu1 %v5340_v35 }
 0x283   :  { %v4485_v51 = vadd.f32 %v2253_v48, %v5790_v1  ;;  %v4517_v52 = vadd.f32 %v2705_v49, %v5792_v2  ;;  %v2255_v53 = vpop.f32.mrb[7].mxu0  ;;  %v2707_v54 = vpop.f32.mrb[7].mxu1  ;;  %3295 = vmatmul.mubr.bf16.vlgmr.msra.gmra.mrb[32].mxu0 %v2834_v33  ;;  %v2778_v61 = vmax.f32 %v4483_v41, 0.0  ;;  %v2780_v62 = vmax.f32 %v4515_v42, 0.0  ;;  %v5341_v49 = vld [vmem:[#allocation11 + $0x28] sm:$0xff]  }
 0x284   :  { %v4486_v56 = vadd.f32 %v2255_v53, %v5796_v3  ;;  %v4518_v57 = vadd.f32 %v2707_v54, %v5798_v4  ;;  %3376 = vmatpush1.bf16.msra.mxu0 %v5282_v40  ;;  %v2779_v7 = vmax.f32 %v4484_v46, 0.0  ;;  %v2781_v8 = vmax.f32 %v4516_v47, 0.0 }
 0x285   :  { %v2782_v0 = vmax.f32 %v4485_v51, 0.0  ;;  %v2784_v5 = vmax.f32 %v4517_v52, 0.0  ;;  %3377 = vmatprep.subr.bf16.mxu0 %v5287_v45  ;;  %v5342_v52 = vld [vmem:[#allocation11 + $0x70] sm:$0xff]   ;;  %4378 = vmatpush3.bf16.msra.mxu1 %v5341_v49 }
 0x286   :  { %v2783_v9 = vmax.f32 %v4486_v56, 0.0  ;;  %v2785_v10 = vmax.f32 %v4518_v57, 0.0  ;;  %v5294_v57 = vld [vmem:[#allocation8 + $0x140] ss:$8 sps:$4 sm:$0xff]   ;;  %4379 = vmatprep.subr.bf16.mxu1 %v5342_v52 }
 0x287   :  { %v2838_v12 = vpack.c.bf16 %v2782_v0, %v2778_v61  ;;  %v5820_v13 = vpack.c.bf16 %v2784_v5, %v2780_v62  ;;  %v5299_v5 = vld [vmem:[#allocation8 + $0x154] ss:$8 sps:$4 sm:$0xff]  }
 0x288   :  { %v2839_v15 = vpack.c.bf16 %v2783_v9, %v2779_v7  ;;  %v5822_v16 = vpack.c.bf16 %v2785_v10, %v2781_v8  ;;  %v2259_v17 = vpop.f32.mrb[8].mxu0  ;;  %v2711_v18 = vpop.f32.mrb[8].mxu1  ;;  %3378 = vmatpush1.bf16.msra.mxu0 %v5285_v58  ;;  %v5343_v10 = vld [vmem:[#allocation11 + $0x30] sm:$0xff]  }
 0x289   :  { %v4487_v20 = vadd.f32 %v2259_v17, %v5790_v1  ;;  %v4519_v21 = vadd.f32 %v2711_v18, %v5792_v2  ;;  %v2261_v22 = vpop.f32.mrb[9].mxu0  ;;  %v2713_v23 = vpop.f32.mrb[9].mxu1  ;;  %3379 = vmatprep.subr.bf16.mxu0 %v5290_v6  ;;  %4380 = vmatpush3.bf16.msra.mxu1 %v5343_v10 }
 0x28a   :  { %v4488_v25 = vadd.f32 %v2261_v22, %v5796_v3  ;;  %v4520_v26 = vadd.f32 %v2713_v23, %v5798_v4  ;;  %v2263_v27 = vpop.f32.mrb[10].mxu0  ;;  %v2715_v28 = vpop.f32.mrb[10].mxu1  ;;  %3304 = vmatprep.mubr.bf16.mxu0 %v2839_v15 }
 0x28b   :  { %v4489_v30 = vadd.f32 %v2263_v27, %v5790_v1  ;;  %v4521_v31 = vadd.f32 %v2715_v28, %v5792_v2  ;;  %v2265_v32 = vpop.f32.mrb[11].mxu0  ;;  %v2717_v33 = vpop.f32.mrb[11].mxu1  ;;  %3305 = vmatmul.mubr.bf16.gmra.mrb[36].mxu0 %v2838_v12  ;;  %v2786_v40 = vmax.f32 %v4487_v20, 0.0  ;;  %v2788_v41 = vmax.f32 %v4519_v21, 0.0 }
 0x28c   :  { %v4490_v36 = vadd.f32 %v2265_v32, %v5796_v3  ;;  %v4522_v38 = vadd.f32 %v2717_v33, %v5798_v4  ;;  %3380 = vmatpush1.bf16.msra.mxu0 %v5288_v19  ;;  %v2787_v45 = vmax.f32 %v4488_v25, 0.0  ;;  %v2789_v46 = vmax.f32 %v4520_v26, 0.0  ;;  %v5297_v19 = vld [vmem:[#allocation8 + $0x150] ss:$8 sps:$4 sm:$0xff]  }
 0x28d   :  { %v2790_v42 = vmax.f32 %v4489_v30, 0.0  ;;  %v2792_v43 = vmax.f32 %v4521_v31, 0.0  ;;  %3381 = vmatprep.subr.bf16.mxu0 %v5293_v24  ;;  %v5302_v24 = vld [vmem:[#allocation8 + $0x164] ss:$8 sps:$4 sm:$0xff]  }
 0x28e   :  { %v2791_v47 = vmax.f32 %v4490_v36, 0.0  ;;  %v2793_v48 = vmax.f32 %v4522_v38, 0.0  ;;  %v5300_v36 = vld [vmem:[#allocation8 + $0x160] ss:$8 sps:$4 sm:$0xff]  }
 0x28f   :  { %v2842_v50 = vpack.c.bf16 %v2790_v42, %v2786_v40  ;;  %v5832_v51 = vpack.c.bf16 %v2792_v43, %v2788_v41  ;;  %v5305_v42 = vld [vmem:[#allocation8 + $0x174] ss:$8 sps:$4 sm:$0xff]  }
 0x290   :  { %v2843_v53 = vpack.c.bf16 %v2791_v47, %v2787_v45  ;;  %v5834_v54 = vpack.c.bf16 %v2793_v48, %v2789_v46  ;;  %v2269_v55 = vpop.f32.mrb[12].mxu0  ;;  %v2721_v56 = vpop.f32.mrb[12].mxu1  ;;  %3382 = vmatpush1.bf16.msra.mxu0 %v5291_v39 }
 0x291   :  { %v4491_v58 = vadd.f32 %v2269_v55, %v5790_v1  ;;  %v4523_v61 = vadd.f32 %v2721_v56, %v5792_v2  ;;  %v2271_v62 = vpop.f32.mrb[13].mxu0  ;;  %v2723_v0 = vpop.f32.mrb[13].mxu1  ;;  %3383 = vmatprep.subr.bf16.mxu0 %v5296_v44  ;;  %v5303_v55 = vld [vmem:[#allocation8 + $0x170] ss:$8 sps:$4 sm:$0xff]  }
 0x292   :  { %v4492_v6 = vadd.f32 %v2271_v62, %v5796_v3  ;;  %v4524_v7 = vadd.f32 %v2723_v0, %v5798_v4  ;;  %v2273_v8 = vpop.f32.mrb[14].mxu0  ;;  %v2725_v9 = vpop.f32.mrb[14].mxu1  ;;  %3314 = vmatprep.mubr.bf16.mxu0 %v2843_v53  ;;  %v5308_v62 = vld [vmem:[#allocation8 + $0x184] ss:$8 sps:$4 sm:$0xff]  }
 0x293   :  { %v4493_v11 = vadd.f32 %v2273_v8, %v5790_v1  ;;  %v4525_v12 = vadd.f32 %v2725_v9, %v5792_v2  ;;  %v2275_v14 = vpop.f32.mrb[15].mxu0  ;;  %v2727_v15 = vpop.f32.mrb[15].mxu1  ;;  %3315 = vmatmul.mubr.bf16.gmra.mrb[40].mxu0 %v2842_v50  ;;  %v2794_v20 = vmax.f32 %v4491_v58, 0.0  ;;  %v2796_v21 = vmax.f32 %v4523_v61, 0.0 }
 0x294   :  { %v4494_v17 = vadd.f32 %v2275_v14, %v5796_v3  ;;  %v4526_v18 = vadd.f32 %v2727_v15, %v5798_v4  ;;  %3384 = vmatpush1.bf16.msra.mxu0 %v5294_v57  ;;  %v2795_v25 = vmax.f32 %v4492_v6, 0.0  ;;  %v2797_v26 = vmax.f32 %v4524_v7, 0.0  ;;  %v5306_v15 = vld [vmem:[#allocation8 + $0x180] ss:$8 sps:$4 sm:$0xff]  }
 0x295   :  { %v2798_v22 = vmax.f32 %v4493_v11, 0.0  ;;  %v2800_v23 = vmax.f32 %v4525_v12, 0.0  ;;  %3385 = vmatprep.subr.bf16.mxu0 %v5299_v5 }
 0x296   :  { %v2799_v27 = vmax.f32 %v4494_v17, 0.0  ;;  %v2801_v28 = vmax.f32 %v4526_v18, 0.0 }
 0x297   :  { %v2846_v29 = vpack.c.bf16 %v2798_v22, %v2794_v20  ;;  %v5844_v30 = vpack.c.bf16 %v2800_v23, %v2796_v21  ;;  %v5311_v21 = vld [vmem:[#allocation8 + $0x194] ss:$8 sps:$4 sm:$0xff]  }
 0x298   :  { %v2847_v31 = vpack.c.bf16 %v2799_v27, %v2795_v25  ;;  %v5846_v32 = vpack.c.bf16 %v2801_v28, %v2797_v26  ;;  %v2279_v33 = vpop.f32.mrb[16].mxu0  ;;  %v2731_v35 = vpop.f32.mrb[16].mxu1  ;;  %3386 = vmatpush1.bf16.msra.mxu0 %v5297_v19 }
 0x299   :  { %v4495_v38 = vadd.f32 %v2279_v33, %v5790_v1  ;;  %v4527_v39 = vadd.f32 %v2731_v35, %v5792_v2  ;;  %v2281_v40 = vpop.f32.mrb[17].mxu0  ;;  %v2733_v41 = vpop.f32.mrb[17].mxu1  ;;  %3387 = vmatprep.subr.bf16.mxu0 %v5302_v24  ;;  %v5309_v35 = vld [vmem:[#allocation8 + $0x190] ss:$8 sps:$4 sm:$0xff]  }
 0x29a   :  { %v4496_v43 = vadd.f32 %v2281_v40, %v5796_v3  ;;  %v4528_v44 = vadd.f32 %v2733_v41, %v5798_v4  ;;  %v2283_v45 = vpop.f32.mrb[18].mxu0  ;;  %v2735_v46 = vpop.f32.mrb[18].mxu1  ;;  %3324 = vmatprep.mubr.bf16.mxu0 %v2847_v31  ;;  %v5314_v41 = vld [vmem:[#allocation8 + $0x1a4] ss:$8 sps:$4 sm:$0xff]  }
 0x29b   :  { %v4497_v47 = vadd.f32 %v2283_v45, %v5790_v1  ;;  %v4529_v48 = vadd.f32 %v2735_v46, %v5792_v2  ;;  %v2285_v49 = vpop.f32.mrb[19].mxu0  ;;  %v2737_v50 = vpop.f32.mrb[19].mxu1  ;;  %3325 = vmatmul.mubr.bf16.gmra.mrb[44].mxu0 %v2846_v29  ;;  %v2802_v56 = vmax.f32 %v4495_v38, 0.0  ;;  %v2804_v57 = vmax.f32 %v4527_v39, 0.0 }
 0x29c   :  { %v4498_v52 = vadd.f32 %v2285_v49, %v5796_v3  ;;  %v4530_v53 = vadd.f32 %v2737_v50, %v5798_v4  ;;  %3388 = vmatpush1.bf16.msra.mxu0 %v5300_v36  ;;  %v2803_v0 = vmax.f32 %v4496_v43, 0.0  ;;  %v2805_v5 = vmax.f32 %v4528_v44, 0.0 }
 0x29d   :  { %v2806_v58 = vmax.f32 %v4497_v47, 0.0  ;;  %v2808_v61 = vmax.f32 %v4529_v48, 0.0  ;;  %3389 = vmatprep.subr.bf16.mxu0 %v5305_v42 }
 0x29e   :  { %v2807_v6 = vmax.f32 %v4498_v52, 0.0  ;;  %v2809_v7 = vmax.f32 %v4530_v53, 0.0  ;;  %v5312_v53 = vld [vmem:[#allocation8 + $0x1a0] ss:$8 sps:$4 sm:$0xff]  }
 0x29f   :  { %v2850_v8 = vpack.c.bf16 %v2806_v58, %v2802_v56  ;;  %v5856_v9 = vpack.c.bf16 %v2808_v61, %v2804_v57  ;;  %v5317_v61 = vld [vmem:[#allocation8 + $0x1b4] ss:$8 sps:$4 sm:$0xff]  }
 0x2a0   :  { %v2851_v10 = vpack.c.bf16 %v2807_v6, %v2803_v0  ;;  %v5858_v11 = vpack.c.bf16 %v2809_v7, %v2805_v5  ;;  %v2289_v12 = vpop.f32.mrb[20].mxu0  ;;  %v2741_v14 = vpop.f32.mrb[20].mxu1  ;;  %3390 = vmatpush1.bf16.msra.mxu0 %v5303_v55 }
 0x2a1   :  { %v4499_v17 = vadd.f32 %v2289_v12, %v5790_v1  ;;  %v4531_v18 = vadd.f32 %v2741_v14, %v5792_v2  ;;  %v2291_v19 = vpop.f32.mrb[21].mxu0  ;;  %v2743_v20 = vpop.f32.mrb[21].mxu1  ;;  %3391 = vmatprep.subr.bf16.mxu0 %v5308_v62 }
 0x2a2   :  { %v4500_v22 = vadd.f32 %v2291_v19, %v5796_v3  ;;  %v4532_v23 = vadd.f32 %v2743_v20, %v5798_v4  ;;  %v2293_v24 = vpop.f32.mrb[22].mxu0  ;;  %v2745_v25 = vpop.f32.mrb[22].mxu1  ;;  %3334 = vmatprep.mubr.bf16.mxu0 %v2851_v10 }
 0x2a3   :  { %v4501_v26 = vadd.f32 %v2293_v24, %v5790_v1  ;;  %v4533_v27 = vadd.f32 %v2745_v25, %v5792_v2  ;;  %v2295_v28 = vpop.f32.mrb[23].mxu0  ;;  %v2747_v29 = vpop.f32.mrb[23].mxu1  ;;  %3335 = vmatmul.mubr.bf16.gmra.mrb[48].mxu0 %v2850_v8  ;;  %v2810_v36 = vmax.f32 %v4499_v17, 0.0  ;;  %v2812_v38 = vmax.f32 %v4531_v18, 0.0  ;;  %v5315_v17 = vld [vmem:[#allocation8 + $0x1b0] ss:$8 sps:$4 sm:$0xff]  }
 0x2a4   :  { %v4502_v31 = vadd.f32 %v2295_v28, %v5796_v3  ;;  %v4534_v33 = vadd.f32 %v2747_v29, %v5798_v4  ;;  %3392 = vmatpush1.bf16.msra.mxu0 %v5306_v15  ;;  %v2811_v42 = vmax.f32 %v4500_v22, 0.0  ;;  %v2813_v43 = vmax.f32 %v4532_v23, 0.0  ;;  %v5320_v22 = vld [vmem:[#allocation8 + $0x1c4] ss:$8 sps:$4 sm:$0xff]  }
 0x2a5   :  { %v2814_v39 = vmax.f32 %v4501_v26, 0.0  ;;  %v2816_v40 = vmax.f32 %v4533_v27, 0.0  ;;  %3393 = vmatprep.subr.bf16.mxu0 %v5311_v21 }
 0x2a6   :  { %v2815_v44 = vmax.f32 %v4502_v31, 0.0  ;;  %v2817_v45 = vmax.f32 %v4534_v33, 0.0 }
 0x2a7   :  { %v2854_v46 = vpack.c.bf16 %v2814_v39, %v2810_v36  ;;  %v5868_v47 = vpack.c.bf16 %v2816_v40, %v2812_v38  ;;  %v5318_v36 = vld [vmem:[#allocation8 + $0x1c0] ss:$8 sps:$4 sm:$0xff]  }
 0x2a8   :  { %v2855_v48 = vpack.c.bf16 %v2815_v44, %v2811_v42  ;;  %v5870_v49 = vpack.c.bf16 %v2817_v45, %v2813_v43  ;;  %v2299_v50 = vpop.f32.mrb[24].mxu0  ;;  %v2751_v52 = vpop.f32.mrb[24].mxu1  ;;  %3394 = vmatpush1.bf16.msra.mxu0 %v5309_v35  ;;  %v5323_v42 = vld [vmem:[#allocation8 + $0x1d4] ss:$8 sps:$4 sm:$0xff]  }
 0x2a9   :  { %v4503_v55 = vadd.f32 %v2299_v50, %v5790_v1  ;;  %v4535_v56 = vadd.f32 %v2751_v52, %v5792_v2  ;;  %v2301_v57 = vpop.f32.mrb[25].mxu0  ;;  %v2753_v58 = vpop.f32.mrb[25].mxu1  ;;  %3395 = vmatprep.subr.bf16.mxu0 %v5314_v41 }
 0x2aa   :  { %v4504_v62 = vadd.f32 %v2301_v57, %v5796_v3  ;;  %v4536_v0 = vadd.f32 %v2753_v58, %v5798_v4  ;;  %v2303_v5 = vpop.f32.mrb[26].mxu0  ;;  %v2755_v6 = vpop.f32.mrb[26].mxu1  ;;  %3344 = vmatprep.mubr.bf16.mxu0 %v2855_v48  ;;  %v5321_v57 = vld [vmem:[#allocation8 + $0x1d0] ss:$8 sps:$4 sm:$0xff]  }
 0x2ab   :  { %v4505_v7 = vadd.f32 %v2303_v5, %v5790_v1  ;;  %v4537_v8 = vadd.f32 %v2755_v6, %v5792_v2  ;;  %v2305_v10 = vpop.f32.mrb[27].mxu0  ;;  %v2757_v12 = vpop.f32.mrb[27].mxu1  ;;  %3345 = vmatmul.mubr.bf16.gmra.mrb[52].mxu0 %v2854_v46  ;;  %v2818_v18 = vmax.f32 %v4503_v55, 0.0  ;;  %v2820_v19 = vmax.f32 %v4535_v56, 0.0  ;;  %v5326_v5 = vld [vmem:[#allocation8 + $0x1e4] ss:$8 sps:$4 sm:$0xff]  }
 0x2ac   :  { %v4506_v14 = vadd.f32 %v2305_v10, %v5796_v3  ;;  %v4538_v15 = vadd.f32 %v2757_v12, %v5798_v4  ;;  %3396 = vmatpush1.bf16.msra.mxu0 %v5312_v53  ;;  %v2819_v23 = vmax.f32 %v4504_v62, 0.0  ;;  %v2821_v24 = vmax.f32 %v4536_v0, 0.0 }
 0x2ad   :  { %v2822_v20 = vmax.f32 %v4505_v7, 0.0  ;;  %v2824_v21 = vmax.f32 %v4537_v8, 0.0  ;;  %3397 = vmatprep.subr.bf16.mxu0 %v5317_v61 }
 0x2ae   :  { %v2823_v25 = vmax.f32 %v4506_v14, 0.0  ;;  %v2825_v26 = vmax.f32 %v4538_v15, 0.0  ;;  %v5327_v15 = vld [vmem:[#allocation8 + $0x1f0] ss:$8 sps:$4 sm:$0xff]  }
 0x2af   :  { %v2858_v27 = vpack.c.bf16 %v2822_v20, %v2818_v18  ;;  %v5880_v28 = vpack.c.bf16 %v2824_v21, %v2820_v19 }
 0x2b0   :  { %v2859_v29 = vpack.c.bf16 %v2823_v25, %v2819_v23  ;;  %v2861_v31 = vpack.c.bf16 %v2825_v26, %v2821_v24  ;;  %v2309_v33 = vpop.f32.mrb[28].mxu0  ;;  %v2761_v35 = vpop.f32.mrb[28].mxu1  ;;  %3398 = vmatpush1.bf16.msra.mxu0 %v5315_v17  ;;  %v5347_v25 = vld [vmem:[#allocation14 + $0x8] sm:$0xff]  }
 0x2b1   :  { %v4507_v38 = vadd.f32 %v2309_v33, %v5790_v1  ;;  %v4539_v39 = vadd.f32 %v2761_v35, %v5792_v2  ;;  %v2311_v40 = vpop.f32.mrb[29].mxu0  ;;  %v2763_v41 = vpop.f32.mrb[29].mxu1  ;;  %3399 = vmatprep.subr.bf16.mxu0 %v5320_v22 }
 0x2b2   :  { %v4508_v43 = vadd.f32 %v2311_v40, %v5796_v3  ;;  %v4540_v44 = vadd.f32 %v2763_v41, %v5798_v4  ;;  %v2313_v45 = vpop.f32.mrb[30].mxu0  ;;  %v2765_v46 = vpop.f32.mrb[30].mxu1  ;;  %3354 = vmatprep.mubr.bf16.mxu0 %v2859_v29 }
 0x2b3   :  { %v4509_v48 = vadd.f32 %v2313_v45, %v5790_v1  ;;  %v4541_v50 = vadd.f32 %v2765_v46, %v5792_v2  ;;  %v2315_v52 = vpop.f32.mrb[31].mxu0  ;;  %v2767_v53 = vpop.f32.mrb[31].mxu1  ;;  %3355 = vmatmul.mubr.bf16.gmra.mrb[56].mxu0 %v2858_v27  ;;  %v2826_v58 = vmax.f32 %v4507_v38, 0.0  ;;  %v2828_v61 = vmax.f32 %v4539_v39, 0.0 }
 0x2b4   :  { %v4510_v55 = vadd.f32 %v2315_v52, %v5796_v3  ;;  %v4542_v56 = vadd.f32 %v2767_v53, %v5798_v4  ;;  %3400 = vmatpush1.bf16.msra.mxu0 %v5318_v36  ;;  %v2827_v6 = vmax.f32 %v4508_v43, 0.0  ;;  %v2829_v7 = vmax.f32 %v4540_v44, 0.0  ;;  %v5324_v3 = vld [vmem:[#allocation8 + $0x1e0] ss:$8 sps:$4 sm:$0xff]   ;;  %v5329_v4 = vld [vmem:[#allocation8 + $0x1f4] ss:$8 sps:$4 sm:$0xff]  }
 0x2b5   :  { %v2830_v62 = vmax.f32 %v4509_v48, 0.0  ;;  %v2832_v0 = vmax.f32 %v4541_v50, 0.0  ;;  %3401 = vmatprep.subr.bf16.mxu0 %v5323_v42  ;;  %v5348_v36 = vld [vmem:[#allocation14 + $0x10] sm:$0xff]  }
 0x2b6   :  { %v2831_v1 = vmax.f32 %v4510_v55, 0.0  ;;  %v2833_v8 = vmax.f32 %v4542_v56, 0.0 }
 0x2b7   :  { %v2862_v2 = vpack.c.bf16 %v2830_v62, %v2826_v58  ;;  %v2864_v10 = vpack.c.bf16 %v2832_v0, %v2828_v61 }
 0x2b8   :  { %v2863_v12 = vpack.c.bf16 %v2831_v1, %v2827_v6  ;;  %v2865_v14 = vpack.c.bf16 %v2833_v8, %v2829_v7  ;;  %3402 = vmatpush1.bf16.msra.mxu0 %v5321_v57 }
 0x2b9   :  { %3403 = vmatprep.subr.bf16.mxu0 %v5326_v5 }
 0x2ba   :  { %3364 = vmatprep.mubr.bf16.mxu0 %v2863_v12 }
 0x2bb   :  { %3365 = vmatmul.mubr.bf16.gmra.mrb[60].mxu0 %v2862_v2 }
 0x2bc   :  { %3404 = vmatpush1.bf16.msra.mxu0 %v5324_v3  ;;  %3407 = vmatprep.mubr.bf16.mxu0 %v5810_v37  ;;  %v5345_v37 = vld [vmem:[#allocation11 + $0x38] sm:$0xff]  }
 0x2bd   :  { %3405 = vmatprep.subr.bf16.mxu0 %v5329_v4 }
 0x2c0   :  { %3406 = vmatpush1.bf16.msra.mxu0 %v5327_v15 }
 0x2c3   :  { %3408 = vmatmul.mubr.bf16.vlgmr.msra.gmra.mrb[32].mxu0 %v5808_v34  ;;  %v5344_v34 = vld [vmem:[#allocation11 + $0x78] sm:$0xff]  }
 0x2c4   :  { %3417 = vmatprep.mubr.bf16.mxu0 %v5822_v16  ;;  %4381 = vmatprep.subr.bf16.mxu1 %v5344_v34  ;;  %v2930_v16 = vld [vmem:[#allocation10] sm:$0x3] }
 0x2c5   :  { %4382 = vmatpush3.bf16.msra.mxu1 %v5345_v37 }
 0x2cb   :  { %3418 = vmatmul.mubr.bf16.gmra.mrb[36].mxu0 %v5820_v13  ;;  %v5346_v13 = vld [vmem:[#allocation14] sm:$0xff]  }
 0x2cc   :  { %3427 = vmatprep.mubr.bf16.mxu0 %v5834_v54  ;;  %4447 = vmatprep.subr.bf16.mxu1 %v5346_v13  ;;  %v5909_v54 = vrot.slane %v2930_v16, %v444_v63 }
 0x2d3   :  { %3428 = vmatmul.mubr.bf16.gmra.mrb[40].mxu0 %v5832_v51  ;;  %v5905_v51 = vrot.slane %v2930_v16, %v440_v60 }
 0x2d4   :  { %3437 = vmatprep.mubr.bf16.mxu0 %v5846_v32 }
 0x2db   :  { %3438 = vmatmul.mubr.bf16.gmra.mrb[44].mxu0 %v5844_v30 }
 0x2dc   :  { %3447 = vmatprep.mubr.bf16.mxu0 %v5858_v11 }
 0x2e3   :  { %3448 = vmatmul.mubr.bf16.gmra.mrb[48].mxu0 %v5856_v9 }
 0x2e4   :  { %3457 = vmatprep.mubr.bf16.mxu0 %v5870_v49 }
 0x2eb   :  { %3458 = vmatmul.mubr.bf16.gmra.mrb[52].mxu0 %v5868_v47 }
 0x2ec   :  { %3467 = vmatprep.mubr.bf16.mxu0 %v2861_v31 }
 0x2f3   :  { %3468 = vmatmul.mubr.bf16.gmra.mrb[56].mxu0 %v5880_v28 }
 0x2f4   :  { %3477 = vmatprep.mubr.bf16.mxu0 %v2865_v14 }
 0x2fb   :  { %3478 = vmatmul.mubr.bf16.gmra.mrb[60].mxu0 %v2864_v10 }
 0x396   :  { %v3409_v30 = vpop.f32.mrb[32].mxu0 }
 0x397   :  { %v4543_v32 = vadd.f32 %v3409_v30, %v5905_v51  ;;  %v3411_v9 = vpop.f32.mrb[33].mxu0 }
 0x398   :  { %v4544_v11 = vadd.f32 %v3411_v9, %v5909_v54  ;;  %v3413_v47 = vpop.f32.mrb[34].mxu0 }
 0x399   :  { %v4545_v49 = vadd.f32 %v3413_v47, %v5905_v51  ;;  %v3415_v17 = vpop.f32.mrb[35].mxu0  ;;  %v3488_v19 = vmax.f32 %v4543_v32, 0.0 }
 0x39a   :  { %v4546_v18 = vadd.f32 %v3415_v17, %v5909_v54  ;;  %v3489_v60 = vmax.f32 %v4544_v11, 0.0 }
 0x39b   :  { %v3490_v20 = vmax.f32 %v4545_v49, 0.0 }
 0x39c   :  { %v3491_v21 = vmax.f32 %v4546_v18, 0.0 }
 0x39d   :  { %v3520_v22 = vpack.c.bf16 %v3490_v20, %v3488_v19 }
 0x39e   :  { %v3521_v59 = vpack.c.bf16 %v3491_v21, %v3489_v60  ;;  %v3419_v63 = vpop.f32.mrb[36].mxu0 }
 0x39f   :  { %v4547_v23 = vadd.f32 %v3419_v63, %v5905_v51  ;;  %v3421_v24 = vpop.f32.mrb[37].mxu0 }
 0x3a0   :  { %v4548_v26 = vadd.f32 %v3421_v24, %v5909_v54  ;;  %v3423_v27 = vpop.f32.mrb[38].mxu0  ;;  %3703 = vmatprep.mubr.bf16.mxu1 %v3521_v59 }
 0x3a1   :  { %v4549_v28 = vadd.f32 %v3423_v27, %v5905_v51  ;;  %v3425_v29 = vpop.f32.mrb[39].mxu0  ;;  %3704 = vmatmul.mubr.bf16.vlgmr.msra.gmra.mrb[32].mxu1 %v3520_v22  ;;  %v3492_v33 = vmax.f32 %v4547_v23, 0.0 }
 0x3a2   :  { %v4550_v31 = vadd.f32 %v3425_v29, %v5909_v54  ;;  %4448 = vmatpush3.bf16.msra.mxu1 %v5346_v13  ;;  %v3493_v38 = vmax.f32 %v4548_v26, 0.0 }
 0x3a3   :  { %v3494_v35 = vmax.f32 %v4549_v28, 0.0  ;;  %4449 = vmatprep.subr.bf16.mxu1 %v5347_v25 }
 0x3a4   :  { %v3495_v39 = vmax.f32 %v4550_v31, 0.0 }
 0x3a5   :  { %v3522_v40 = vpack.c.bf16 %v3494_v35, %v3492_v33 }
 0x3a6   :  { %v3523_v41 = vpack.c.bf16 %v3495_v39, %v3493_v38  ;;  %v3429_v42 = vpop.f32.mrb[40].mxu0  ;;  %4450 = vmatpush3.bf16.msra.mxu1 %v5347_v25 }
 0x3a7   :  { %v4551_v43 = vadd.f32 %v3429_v42, %v5905_v51  ;;  %v3431_v44 = vpop.f32.mrb[41].mxu0  ;;  %4451 = vmatprep.subr.bf16.mxu1 %v5348_v36 }
 0x3a8   :  { %v4552_v45 = vadd.f32 %v3431_v44, %v5909_v54  ;;  %v3433_v46 = vpop.f32.mrb[42].mxu0  ;;  %3711 = vmatprep.mubr.bf16.mxu1 %v3523_v41 }
 0x3a9   :  { %v4553_v48 = vadd.f32 %v3433_v46, %v5905_v51  ;;  %v3435_v50 = vpop.f32.mrb[43].mxu0  ;;  %3712 = vmatmul.mubr.bf16.gmra.mrb[36].mxu1 %v3522_v40  ;;  %v3496_v53 = vmax.f32 %v4551_v43, 0.0 }
 0x3aa   :  { %v4554_v52 = vadd.f32 %v3435_v50, %v5909_v54  ;;  %4452 = vmatpush3.bf16.msra.mxu1 %v5348_v36  ;;  %v3497_v56 = vmax.f32 %v4552_v45, 0.0 }
 0x3ab   :  { %v3498_v55 = vmax.f32 %v4553_v48, 0.0 }
 0x3ac   :  { %v3499_v57 = vmax.f32 %v4554_v52, 0.0 }
 0x3ad   :  { %v3524_v58 = vpack.c.bf16 %v3498_v55, %v3496_v53 }
 0x3ae   :  { %v3525_v61 = vpack.c.bf16 %v3499_v57, %v3497_v56  ;;  %v3439_v62 = vpop.f32.mrb[44].mxu0 }
 0x3af   :  { %v4555_v0 = vadd.f32 %v3439_v62, %v5905_v51  ;;  %v3441_v5 = vpop.f32.mrb[45].mxu0 }
 0x3b0   :  { %v4556_v6 = vadd.f32 %v3441_v5, %v5909_v54  ;;  %v3443_v7 = vpop.f32.mrb[46].mxu0  ;;  %3719 = vmatprep.mubr.bf16.mxu1 %v3525_v61 }
 0x3b1   :  { %v4557_v1 = vadd.f32 %v3443_v7, %v5905_v51  ;;  %v3445_v8 = vpop.f32.mrb[47].mxu0  ;;  %3720 = vmatmul.mubr.bf16.gmra.mrb[40].mxu1 %v3524_v58  ;;  %v3500_v10 = vmax.f32 %v4555_v0, 0.0 }
 0x3b2   :  { %v4558_v2 = vadd.f32 %v3445_v8, %v5909_v54  ;;  %v3501_v14 = vmax.f32 %v4556_v6, 0.0 }
 0x3b3   :  { %v3502_v12 = vmax.f32 %v4557_v1, 0.0 }
 0x3b4   :  { %v3503_v3 = vmax.f32 %v4558_v2, 0.0 }
 0x3b5   :  { %v3526_v4 = vpack.c.bf16 %v3502_v12, %v3500_v10  ;;  %v5349_v10 = vld [vmem:[#allocation14 + $0x18] sm:$0xff]   ;;  %v5350_v12 = vld [vmem:[#allocation14 + $0x20] sm:$0xff]  }
 0x3b6   :  { %v3527_v15 = vpack.c.bf16 %v3503_v3, %v3501_v14  ;;  %v3449_v34 = vpop.f32.mrb[48].mxu0  ;;  %4453 = vmatprep.subr.bf16.mxu1 %v5349_v10  ;;  %v5351_v14 = vld [vmem:[#allocation14 + $0x28] sm:$0xff]  }
 0x3b7   :  { %v4559_v37 = vadd.f32 %v3449_v34, %v5905_v51  ;;  %v3451_v13 = vpop.f32.mrb[49].mxu0  ;;  %4454 = vmatpush3.bf16.msra.mxu1 %v5349_v10 }
 0x3b8   :  { %v4560_v16 = vadd.f32 %v3451_v13, %v5909_v54  ;;  %v3453_v30 = vpop.f32.mrb[50].mxu0  ;;  %3727 = vmatprep.mubr.bf16.mxu1 %v3527_v15  ;;  %4455 = vmatprep.subr.bf16.mxu1 %v5350_v12 }
 0x3b9   :  { %v4561_v32 = vadd.f32 %v3453_v30, %v5905_v51  ;;  %v3455_v9 = vpop.f32.mrb[51].mxu0  ;;  %3728 = vmatmul.mubr.bf16.gmra.mrb[44].mxu1 %v3526_v4  ;;  %v3504_v47 = vmax.f32 %v4559_v37, 0.0  ;;  %v5943_v4 = vld [vmem:[#allocation13] ss:$0 sm:$0xff] }
 0x3ba   :  { %v4562_v11 = vadd.f32 %v3455_v9, %v5909_v54  ;;  %v3505_v17 = vmax.f32 %v4560_v16, 0.0 }
 0x3bb   :  { %v3506_v49 = vmax.f32 %v4561_v32, 0.0  ;;  %4456 = vmatpush3.bf16.msra.mxu1 %v5350_v12 }
 0x3bc   :  { %v3507_v18 = vmax.f32 %v4562_v11, 0.0  ;;  %4457 = vmatprep.subr.bf16.mxu1 %v5351_v14 }
 0x3bd   :  { %v3528_v19 = vpack.c.bf16 %v3506_v49, %v3504_v47 }
 0x3be   :  { %v3529_v20 = vpack.c.bf16 %v3507_v18, %v3505_v17  ;;  %v3459_v60 = vpop.f32.mrb[52].mxu0 }
 0x3bf   :  { %v4563_v21 = vadd.f32 %v3459_v60, %v5905_v51  ;;  %v3461_v22 = vpop.f32.mrb[53].mxu0  ;;  %4458 = vmatpush3.bf16.msra.mxu1 %v5351_v14 }
 0x3c0   :  { %v4564_v59 = vadd.f32 %v3461_v22, %v5909_v54  ;;  %v3463_v63 = vpop.f32.mrb[54].mxu0  ;;  %3735 = vmatprep.mubr.bf16.mxu1 %v3529_v20 }
 0x3c1   :  { %v4565_v23 = vadd.f32 %v3463_v63, %v5905_v51  ;;  %v3465_v24 = vpop.f32.mrb[55].mxu0  ;;  %3736 = vmatmul.mubr.bf16.gmra.mrb[48].mxu1 %v3528_v19  ;;  %v3508_v26 = vmax.f32 %v4563_v21, 0.0 }
 0x3c2   :  { %v4566_v25 = vadd.f32 %v3465_v24, %v5909_v54  ;;  %v3509_v28 = vmax.f32 %v4564_v59, 0.0 }
 0x3c3   :  { %v3510_v27 = vmax.f32 %v4565_v23, 0.0 }
 0x3c4   :  { %v3511_v29 = vmax.f32 %v4566_v25, 0.0 }
 0x3c5   :  { %v3530_v31 = vpack.c.bf16 %v3510_v27, %v3508_v26 }
 0x3c6   :  { %v3531_v33 = vpack.c.bf16 %v3511_v29, %v3509_v28  ;;  %v3469_v35 = vpop.f32.mrb[56].mxu0 }
 0x3c7   :  { %v4567_v36 = vadd.f32 %v3469_v35, %v5905_v51  ;;  %v3471_v38 = vpop.f32.mrb[57].mxu0 }
 0x3c8   :  { %v4568_v39 = vadd.f32 %v3471_v38, %v5909_v54  ;;  %v3473_v40 = vpop.f32.mrb[58].mxu0  ;;  %3743 = vmatprep.mubr.bf16.mxu1 %v3531_v33 }
 0x3c9   :  { %v4569_v41 = vadd.f32 %v3473_v40, %v5905_v51  ;;  %v3475_v42 = vpop.f32.mrb[59].mxu0  ;;  %3744 = vmatmul.mubr.bf16.gmra.mrb[52].mxu1 %v3530_v31  ;;  %v3512_v44 = vmax.f32 %v4567_v36, 0.0 }
 0x3ca   :  { %v4570_v43 = vadd.f32 %v3475_v42, %v5909_v54  ;;  %v3513_v46 = vmax.f32 %v4568_v39, 0.0 }
 0x3cb   :  { %v3514_v45 = vmax.f32 %v4569_v41, 0.0 }
 0x3cc   :  { %v3515_v48 = vmax.f32 %v4570_v43, 0.0 }
 0x3cd   :  { %v3532_v50 = vpack.c.bf16 %v3514_v45, %v3512_v44 }
 0x3ce   :  { %v3533_v52 = vpack.c.bf16 %v3515_v48, %v3513_v46  ;;  %v3479_v53 = vpop.f32.mrb[60].mxu0 }
 0x3cf   :  { %v4571_v55 = vadd.f32 %v3479_v53, %v5905_v51  ;;  %v3481_v56 = vpop.f32.mrb[61].mxu0 }
 0x3d0   :  { %v4572_v57 = vadd.f32 %v3481_v56, %v5909_v54  ;;  %v3483_v58 = vpop.f32.mrb[62].mxu0  ;;  %3751 = vmatprep.mubr.bf16.mxu1 %v3533_v52 }
 0x3d1   :  { %v4573_v61 = vadd.f32 %v3483_v58, %v5905_v51  ;;  %v3485_v62 = vpop.f32.mrb[63].mxu0  ;;  %3752 = vmatmul.mubr.bf16.gmra.mrb[56].mxu1 %v3532_v50  ;;  %v3516_v5 = vmax.f32 %v4571_v55, 0.0  ;;  %v5352_v51 = vld [vmem:[#allocation14 + $0x30] sm:$0xff]  }
 0x3d2   :  { %v4574_v0 = vadd.f32 %v3485_v62, %v5909_v54  ;;  %v3517_v7 = vmax.f32 %v4572_v57, 0.0  ;;  %4459 = vmatprep.subr.bf16.mxu1 %v5352_v51  ;;  %v5353_v54 = vld [vmem:[#allocation14 + $0x38] sm:$0xff]  }
 0x3d3   :  { %v3518_v6 = vmax.f32 %v4573_v61, 0.0  ;;  %4460 = vmatpush3.bf16.msra.mxu1 %v5352_v51 }
 0x3d4   :  { %v3519_v1 = vmax.f32 %v4574_v0, 0.0  ;;  %4461 = vmatprep.subr.bf16.mxu1 %v5353_v54 }
 0x3d5   :  { %v3534_v8 = vpack.c.bf16 %v3518_v6, %v3516_v5 }
 0x3d6   :  { %v3535_v2 = vpack.c.bf16 %v3519_v1, %v3517_v7 }
 0x3d7   :  { %4462 = vmatpush3.bf16.msra.mxu1 %v5353_v54 }
 0x3d8   :  { %3759 = vmatprep.mubr.bf16.mxu1 %v3535_v2 }
 0x3d9   :  { %3760 = vmatmul.mubr.bf16.gmra.mrb[60].mxu1 %v3534_v8 }
 0x474   :  { %v4383_v3 = vpop.f32.mrb[32].mxu1 }
 0x475   :  { %v4384_v15 = vpop.f32.mrb[33].mxu1 }
 0x476   :  { %v4385_v34 = vadd.f32 %v4384_v15, %v4383_v3  ;;  %v4386_v37 = vpop.f32.mrb[34].mxu1 }
 0x477   :  { %v4387_v13 = vpop.f32.mrb[35].mxu1 }
 0x478   :  { %v3706_v16 = vadd.f32 %v4385_v34, %v5943_v4  ;;  %v4388_v30 = vadd.f32 %v4387_v13, %v4386_v37 }
 0x47a   :  { %v3709_v32 = vadd.f32 %v4388_v30, %v5943_v4  ;;  %v3768_v9 = vmax.f32 %v3706_v16, 0.0 }
 0x47c   :  { %v3769_v11 = vmax.f32 %v3709_v32, 0.0  ;;  %v4389_v47 = vpop.f32.mrb[36].mxu1 }
 0x47d   :  { %v4390_v49 = vpop.f32.mrb[37].mxu1 }
 0x47e   :  { %v4391_v17 = vadd.f32 %v4390_v49, %v4389_v47  ;;  %v4392_v18 = vpop.f32.mrb[38].mxu1  ;;  %v3784_v19 = vpack.c.bf16 %v3769_v11, %v3768_v9 }
 0x47f   :  { %v4393_v20 = vpop.f32.mrb[39].mxu1 }
 0x480   :  { %v3714_v60 = vadd.f32 %v4391_v17, %v5943_v4  ;;  %v4394_v21 = vadd.f32 %v4393_v20, %v4392_v18  ;;  %4463 = vmatprep.mubr.bf16.mxu1 %v3784_v19 }
 0x482   :  { %v3717_v22 = vadd.f32 %v4394_v21, %v5943_v4  ;;  %v3770_v59 = vmax.f32 %v3714_v60, 0.0 }
 0x484   :  { %v3771_v63 = vmax.f32 %v3717_v22, 0.0  ;;  %v4395_v23 = vpop.f32.mrb[40].mxu1 }
 0x485   :  { %v4396_v24 = vpop.f32.mrb[41].mxu1 }
 0x486   :  { %v3785_v25 = vpack.c.bf16 %v3771_v63, %v3770_v59  ;;  %v4397_v26 = vadd.f32 %v4396_v24, %v4395_v23  ;;  %v4398_v27 = vpop.f32.mrb[42].mxu1 }
 0x487   :  { %v4399_v28 = vpop.f32.mrb[43].mxu1 }
 0x488   :  { %v3722_v29 = vadd.f32 %v4397_v26, %v5943_v4  ;;  %v4400_v31 = vadd.f32 %v4399_v28, %v4398_v27  ;;  %4464 = vmatmul.mubr.bf16.vlgmr.msra.gmra.mrb[64].mxu1 %v3785_v25  ;;  %v4358_v27 = vld [vmem:[#allocation16] ss:$0 sm:$0xff] }
 0x48a   :  { %v3725_v33 = vadd.f32 %v4400_v31, %v5943_v4  ;;  %v3772_v35 = vmax.f32 %v3722_v29, 0.0 }
 0x48c   :  { %v3773_v36 = vmax.f32 %v3725_v33, 0.0  ;;  %v4401_v38 = vpop.f32.mrb[44].mxu1 }
 0x48d   :  { %v4402_v39 = vpop.f32.mrb[45].mxu1 }
 0x48e   :  { %v4403_v40 = vadd.f32 %v4402_v39, %v4401_v38  ;;  %v4404_v41 = vpop.f32.mrb[46].mxu1  ;;  %v3786_v42 = vpack.c.bf16 %v3773_v36, %v3772_v35 }
 0x48f   :  { %v4405_v43 = vpop.f32.mrb[47].mxu1 }
 0x490   :  { %v3730_v44 = vadd.f32 %v4403_v40, %v5943_v4  ;;  %v4406_v45 = vadd.f32 %v4405_v43, %v4404_v41  ;;  %4467 = vmatprep.mubr.bf16.mxu1 %v3786_v42 }
 0x492   :  { %v3733_v46 = vadd.f32 %v4406_v45, %v5943_v4  ;;  %v3774_v48 = vmax.f32 %v3730_v44, 0.0 }
 0x494   :  { %v3775_v50 = vmax.f32 %v3733_v46, 0.0  ;;  %v4407_v52 = vpop.f32.mrb[48].mxu1 }
 0x495   :  { %v4408_v53 = vpop.f32.mrb[49].mxu1 }
 0x496   :  { %v4409_v55 = vadd.f32 %v4408_v53, %v4407_v52  ;;  %v4410_v56 = vpop.f32.mrb[50].mxu1  ;;  %v3787_v57 = vpack.c.bf16 %v3775_v50, %v3774_v48 }
 0x497   :  { %v4411_v58 = vpop.f32.mrb[51].mxu1 }
 0x498   :  { %v3738_v61 = vadd.f32 %v4409_v55, %v5943_v4  ;;  %v4412_v62 = vadd.f32 %v4411_v58, %v4410_v56  ;;  %4468 = vmatmul.mubr.bf16.gmra.mrb[68].mxu1 %v3787_v57 }
 0x49a   :  { %v3741_v0 = vadd.f32 %v4412_v62, %v5943_v4  ;;  %v3776_v5 = vmax.f32 %v3738_v61, 0.0 }
 0x49c   :  { %v3777_v6 = vmax.f32 %v3741_v0, 0.0  ;;  %v4413_v7 = vpop.f32.mrb[52].mxu1 }
 0x49d   :  { %v4414_v1 = vpop.f32.mrb[53].mxu1 }
 0x49e   :  { %v4415_v8 = vadd.f32 %v4414_v1, %v4413_v7  ;;  %v4416_v2 = vpop.f32.mrb[54].mxu1  ;;  %v3788_v10 = vpack.c.bf16 %v3777_v6, %v3776_v5 }
 0x49f   :  { %v4417_v12 = vpop.f32.mrb[55].mxu1 }
 0x4a0   :  { %v3746_v14 = vadd.f32 %v4415_v8, %v5943_v4  ;;  %v4418_v51 = vadd.f32 %v4417_v12, %v4416_v2  ;;  %4471 = vmatprep.mubr.bf16.mxu1 %v3788_v10 }
 0x4a2   :  { %v3749_v54 = vadd.f32 %v4418_v51, %v5943_v4  ;;  %v3778_v3 = vmax.f32 %v3746_v14, 0.0 }
 0x4a4   :  { %v3779_v15 = vmax.f32 %v3749_v54, 0.0  ;;  %v4419_v34 = vpop.f32.mrb[56].mxu1 }
 0x4a5   :  { %v4420_v37 = vpop.f32.mrb[57].mxu1 }
 0x4a6   :  { %v4421_v13 = vadd.f32 %v4420_v37, %v4419_v34  ;;  %v4422_v16 = vpop.f32.mrb[58].mxu1  ;;  %v3789_v30 = vpack.c.bf16 %v3779_v15, %v3778_v3 }
 0x4a7   :  { %v4423_v32 = vpop.f32.mrb[59].mxu1 }
 0x4a8   :  { %v3754_v9 = vadd.f32 %v4421_v13, %v5943_v4  ;;  %v4424_v11 = vadd.f32 %v4423_v32, %v4422_v16  ;;  %4472 = vmatmul.mubr.bf16.gmra.mrb[72].mxu1 %v3789_v30 }
 0x4aa   :  { %v3757_v47 = vadd.f32 %v4424_v11, %v5943_v4  ;;  %v3780_v49 = vmax.f32 %v3754_v9, 0.0 }
 0x4ac   :  { %v3781_v17 = vmax.f32 %v3757_v47, 0.0  ;;  %v4425_v18 = vpop.f32.mrb[60].mxu1 }
 0x4ad   :  { %v4426_v19 = vpop.f32.mrb[61].mxu1 }
 0x4ae   :  { %v4427_v20 = vadd.f32 %v4426_v19, %v4425_v18  ;;  %v4428_v60 = vpop.f32.mrb[62].mxu1  ;;  %v3790_v21 = vpack.c.bf16 %v3781_v17, %v3780_v49 }
 0x4af   :  { %v4429_v22 = vpop.f32.mrb[63].mxu1 }
 0x4b0   :  { %v3762_v59 = vadd.f32 %v4427_v20, %v5943_v4  ;;  %v4430_v63 = vadd.f32 %v4429_v22, %v4428_v60  ;;  %4475 = vmatprep.mubr.bf16.mxu1 %v3790_v21 }
 0x4b2   :  { %v3765_v23 = vadd.f32 %v4430_v63, %v5943_v4  ;;  %v3782_v24 = vmax.f32 %v3762_v59, 0.0 }
 0x4b4   :  { %v3783_v25 = vmax.f32 %v3765_v23, 0.0 }
 0x4b6   :  { %v3791_v26 = vpack.c.bf16 %v3783_v25, %v3782_v24 }
 0x4b8   :  { %4476 = vmatmul.mubr.bf16.gmra.mrb[76].mxu1 %v3791_v26 }
 0x55b   :  { %v4465_v28 = vpop.f32.mrb[64].mxu1 }
 0x55c   :  { %v3906_v29 = vadd.f32 %v4465_v28, %v4358_v27  ;;  %v3897_v31 = vpop.f32.mrb[65].mxu1 }
 0x55d   :  { %v3898_v33 = vadd.f32 %v4358_v27, %v3897_v31  ;;  %v4466_v35 = vpop.f32.mrb[66].mxu1 }
 0x55e   :  { %3962 = vst [vmem:[#allocation17 + $0x10] sm:$0xff] %v3906_v29  ;;  %v3909_v36 = vadd.f32 %v4466_v35, %v4358_v27  ;;  %v3900_v38 = vpop.f32.mrb[67].mxu1 }
 0x55f   :  { %3960 = vst [vmem:[#allocation17] sm:$0xff] %v3898_v33  ;;  %v3901_v39 = vadd.f32 %v4358_v27, %v3900_v38 }
 0x560   :  { %3963 = vst [vmem:[#allocation17 + $0x18] sm:$0xff] %v3909_v36 }
 0x561   :  { %3961 = vst [vmem:[#allocation17 + $0x8] sm:$0xff] %v3901_v39 }
 0x56b   :  { %v4469_v40 = vpop.f32.mrb[68].mxu1 }
 0x56c   :  { %v3922_v41 = vadd.f32 %v4469_v40, %v4358_v27  ;;  %v3913_v4 = vpop.f32.mrb[69].mxu1 }
 0x56d   :  { %v3914_v42 = vadd.f32 %v4358_v27, %v3913_v4  ;;  %v4470_v43 = vpop.f32.mrb[70].mxu1 }
 0x56e   :  { %3966 = vst [vmem:[#allocation17 + $0x30] sm:$0xff] %v3922_v41  ;;  %v3925_v44 = vadd.f32 %v4470_v43, %v4358_v27  ;;  %v3916_v45 = vpop.f32.mrb[71].mxu1 }
 0x56f   :  { %3964 = vst [vmem:[#allocation17 + $0x20] sm:$0xff] %v3914_v42  ;;  %v3917_v46 = vadd.f32 %v4358_v27, %v3916_v45 }
 0x570   :  { %3967 = vst [vmem:[#allocation17 + $0x38] sm:$0xff] %v3925_v44 }
 0x571   :  { %3965 = vst [vmem:[#allocation17 + $0x28] sm:$0xff] %v3917_v46 }
 0x57b   :  { %v4473_v48 = vpop.f32.mrb[72].mxu1 }
 0x57c   :  { %v3938_v50 = vadd.f32 %v4473_v48, %v4358_v27  ;;  %v3929_v52 = vpop.f32.mrb[73].mxu1 }
 0x57d   :  { %v3930_v53 = vadd.f32 %v4358_v27, %v3929_v52  ;;  %v4474_v55 = vpop.f32.mrb[74].mxu1 }
 0x57e   :  { %3970 = vst [vmem:[#allocation17 + $0x50] sm:$0xff] %v3938_v50  ;;  %v3941_v56 = vadd.f32 %v4474_v55, %v4358_v27  ;;  %v3932_v57 = vpop.f32.mrb[75].mxu1 }
 0x57f   :  { %3968 = vst [vmem:[#allocation17 + $0x40] sm:$0xff] %v3930_v53  ;;  %v3933_v58 = vadd.f32 %v4358_v27, %v3932_v57 }
 0x580   :  { %3971 = vst [vmem:[#allocation17 + $0x58] sm:$0xff] %v3941_v56 }
 0x581   :  { %3969 = vst [vmem:[#allocation17 + $0x48] sm:$0xff] %v3933_v58 }
 0x58b   :  { %v4477_v61 = vpop.f32.mrb[76].mxu1 }
 0x58c   :  { %v3954_v62 = vadd.f32 %v4477_v61, %v4358_v27  ;;  %v3945_v0 = vpop.f32.mrb[77].mxu1 }
 0x58d   :  { %v3946_v5 = vadd.f32 %v4358_v27, %v3945_v0  ;;  %v4478_v6 = vpop.f32.mrb[78].mxu1 }
 0x58e   :  { %3974 = vst [vmem:[#allocation17 + $0x70] sm:$0xff] %v3954_v62  ;;  %v3957_v7 = vadd.f32 %v4478_v6, %v4358_v27  ;;  %v3948_v1 = vpop.f32.mrb[79].mxu1 }
 0x58f   :  { %3972 = vst [vmem:[#allocation17 + $0x60] sm:$0xff] %v3946_v5  ;;  %v3949_v8 = vadd.f32 %v4358_v27, %v3948_v1 }
 0x590   :  { %3975 = vst [vmem:[#allocation17 + $0x78] sm:$0xff] %v3957_v7 }
 0x591   :  { %3973 = vst [vmem:[#allocation17 + $0x68] sm:$0xff] %v3949_v8 }
 0x592   :  { %5563 = shalt.err (!%p5560_p6)
}
 0x593   :  { %s5564_s14 = scalar_lea.hbm %s5985_s9, 2048 }
 0x594   :  { %p5565_p7 = scmp.ne.s32.totalorder %s5985_s9, %s5564_s14  ;;  %p5568_p8 = scmp.lt.u32.totalorder %s5564_s14, %s5985_s9 }
 0x596   :  { %p5570_p9 = pnand %p5568_p8, %p5565_p7 }
 0x598   :  { %5573 = shalt.err (!%p5570_p9)
}
 0x599   :  { %3987 = dma.vmem_to_hbm [thread:$0]  %s3982_s24, 2048, %s5985_s9, [#allocation4], %s5590_s1, %s5590_s1, %s5591_s10  }
 0x59a   :  { %5584 = dma.done.wait [#allocation4], 2048  }
 0x59b   :  { %5585 = vsyncadd [#allocation4], 4294965248 }
 0x59c   :  { %3991 = vsyncpa [#allocation3], 1 }
 0x59d   :  { %3992 = vsyncpa [#allocation6], 1 }
 0x59e   :  { %3993 = vsyncpa [#allocation9], 1 }
 0x59f   :  { %3994 = vsyncpa [#allocation12], 1 }
 0x5a0   :  { %3995 = vsyncpa [#allocation15], 1 }
 0x5a1   :  { %3996 = vsyncpa [#allocation4], 1 }

</bundles_post_ra>
